<compile_context>
chip_gen: v7x
topology: tpu7x:2x2x1
jax: 0.10.0
libtpu: 0.0.40
codegen_flags: <defaults>
</compile_context>

<pallas_src>
import jax
import jax.numpy as jnp
from jax.experimental import pallas as pl
from jax.experimental.pallas import tpu as pltpu

_INV_SQRT2 = 0.7071067811865476


def _gelu_exact(v):
    # nn.GELU() default: exact erf-based GELU (computed in f32).
    return 0.5 * v * (1.0 + jax.lax.erf(v * _INV_SQRT2))


def dino_head_kernel(x_ref, w1_ref, b1_ref, w2_ref, b2_ref, w3_ref, b3_ref,
                     wv_ref, invg_ref, o_ref, z_ref):
    cdt = w1_ref.dtype  # MXU input dtype (f32 or bf16); accumulation is f32.

    # ---- MLP + L2 normalize: only once per batch tile (j == 0) -------------
    @pl.when(pl.program_id(1) == 0)
    def _compute_bottleneck():
        x = x_ref[...].astype(cdt)
        h = jnp.dot(x, w1_ref[...], preferred_element_type=jnp.float32)
        h = _gelu_exact(h + b1_ref[...])
        h = jnp.dot(h.astype(cdt), w2_ref[...],
                    preferred_element_type=jnp.float32)
        h = _gelu_exact(h + b2_ref[...])
        z = jnp.dot(h.astype(cdt), w3_ref[...],
                    preferred_element_type=jnp.float32) + b3_ref[...]
        # F.normalize(z, dim=-1, p=2, eps=1e-12):
        # rsqrt(max(sumsq, 1e-24)) == 1 / max(||z||, 1e-12); rsqrt -> EUP slot.
        sumsq = jnp.sum(z * z, axis=-1, keepdims=True)
        inv_norm = jax.lax.rsqrt(jnp.maximum(sumsq, 1e-24))
        z_ref[...] = (z * inv_norm).astype(z_ref.dtype)

    # ---- weight-normalized last layer, streamed over out_dim tiles ---------
    # Column normalization of Wv is hoisted: apply precomputed inv column
    # norms as a post-matmul scale instead of materializing Wv / ||Wv||_col.
    y = jnp.dot(z_ref[...], wv_ref[...], preferred_element_type=jnp.float32)
    o_ref[...] = (y * invg_ref[...]).astype(o_ref.dtype)


def dino_head_forward(x, params, *, tile_b=256, tile_n=2048,
                      vmem_limit_bytes=None):
    """x: (N, in_dim) float32 -> (N, out_dim) float32."""
    w1, b1, w2, b2, w3, b3, wv = params
    n, in_dim = x.shape
    hidden = w1.shape[1]
    bottleneck = w3.shape[1]
    out_dim = wv.shape[1]

    tile_b = min(tile_b, n)
    tile_n = min(tile_n, out_dim)
    assert n % tile_b == 0, (n, tile_b)
    assert out_dim % tile_n == 0, (out_dim, tile_n)
    # Lane-dense output stores (unmasked vst) unless out_dim itself is small.
    assert tile_n % 128 == 0 or tile_n == out_dim

    # weight_norm column scale (weight_g frozen to 1): tiny one-time XLA op.
    inv_g = jax.lax.rsqrt(
        jnp.sum(wv.astype(jnp.float32) ** 2, axis=0, keepdims=True))

    rep = lambda shape: pl.BlockSpec(shape, lambda i, j: (0, 0))
    grid = (n // tile_b, out_dim // tile_n)

    return pl.pallas_call(
        dino_head_kernel,
        out_shape=jax.ShapeDtypeStruct((n, out_dim), jnp.float32),
        grid_spec=pltpu.PrefetchScalarGridSpec(
            num_scalar_prefetch=0,
            grid=grid,
            in_specs=[
                pl.BlockSpec((tile_b, in_dim), lambda i, j: (i, 0)),      # x tile
                rep((in_dim, hidden)),                                    # W1
                rep((1, hidden)),                                         # b1
                rep((hidden, hidden)),                                    # W2
                rep((1, hidden)),                                         # b2
                rep((hidden, bottleneck)),                                # W3
                rep((1, bottleneck)),                                     # b3
                pl.BlockSpec((bottleneck, tile_n), lambda i, j: (0, j)),  # Wv tile
                pl.BlockSpec((1, tile_n), lambda i, j: (0, j)),           # inv col norm
            ],
            out_specs=pl.BlockSpec((tile_b, tile_n), lambda i, j: (i, j)),
            # Persistent bottleneck activation for the current batch tile;
            # out_dim axis must be innermost + "arbitrary" so z stays valid.
            scratch_shapes=[pltpu.VMEM((tile_b, bottleneck), wv.dtype)],
        ),
        compiler_params=pltpu.CompilerParams(
            dimension_semantics=("parallel", "arbitrary"),
            vmem_limit_bytes=vmem_limit_bytes),
    )(x, w1, b1, w2, b2, w3, b3, wv, inv_g)


def init_params(key, in_dim, hidden_dim, bottleneck_dim, out_dim,
                dtype=jnp.float32):
    """Synthetic init mirroring DINOHead.__init__ shapes.

    trunc_normal_(std=0.02) weights (pre-transposed to (fan_in, fan_out)),
    zero biases (kept f32), weight_v also trunc-normal for determinism,
    weight_g == 1 folded into the kernel's hoisted column normalization.
    """
    ks = jax.random.split(key, 4)
    tn = lambda k, shape: (0.02 * jax.random.truncated_normal(
        k, -2.0, 2.0, shape, dtype=jnp.float32)).astype(dtype)
    w1 = tn(ks[0], (in_dim, hidden_dim))
    b1 = jnp.zeros((1, hidden_dim), jnp.float32)
    w2 = tn(ks[1], (hidden_dim, hidden_dim))
    b2 = jnp.zeros((1, hidden_dim), jnp.float32)
    w3 = tn(ks[2], (hidden_dim, bottleneck_dim))
    b3 = jnp.zeros((1, bottleneck_dim), jnp.float32)
    wv = tn(ks[3], (bottleneck_dim, out_dim))
    return (w1, b1, w2, b2, w3, b3, wv)


def reference_forward(x, params):
    """Pure-JAX reference mirroring the kernel's dtype handling exactly."""
    w1, b1, w2, b2, w3, b3, wv = params
    cdt = w1.dtype
    f32 = jnp.float32
    up = lambda a: a.astype(cdt).astype(f32)
    h = _gelu_exact(up(x) @ w1.astype(f32) + b1)
    h = _gelu_exact(up(h) @ w2.astype(f32) + b2)
    z = up(h) @ w3.astype(f32) + b3
    z = z * jax.lax.rsqrt(
        jnp.maximum(jnp.sum(z * z, axis=-1, keepdims=True), 1e-24))
    inv_g = jax.lax.rsqrt(jnp.sum(wv.astype(f32) ** 2, axis=0, keepdims=True))
    return (up(z) @ wv.astype(f32)) * inv_g


if __name__ == "__main__":
    # Small shapes consistent with DINOHead (real: 768/2048/256/65536),
    # chosen so the 2-D tiling (2 batch tiles x 2 out_dim tiles) is exercised.
    N, IN_DIM, HIDDEN, BOTTLENECK, OUT_DIM = 256, 128, 256, 128, 256
    TILE_B, TILE_N = 128, 128

    key = jax.random.PRNGKey(0)
    kx, kp = jax.random.split(key)
    x = jax.random.normal(kx, (N, IN_DIM), dtype=jnp.float32)

    # --- f32 parameters: exact-semantics check (tight tolerance) ------------
    p32 = init_params(kp, IN_DIM, HIDDEN, BOTTLENECK, OUT_DIM, jnp.float32)
    out32 = jax.block_until_ready(
        dino_head_forward(x, p32, tile_b=TILE_B, tile_n=TILE_N))
    ref32 = reference_forward(x, p32)
    assert out32.shape == (N, OUT_DIM)
    assert jnp.allclose(out32, ref32, atol=1e-4, rtol=1e-4), \
        float(jnp.max(jnp.abs(out32 - ref32)))

    # --- bf16 weights: the recommended performance configuration ------------
    pbf = init_params(kp, IN_DIM, HIDDEN, BOTTLENECK, OUT_DIM, jnp.bfloat16)
    outbf = jax.block_until_ready(
        dino_head_forward(x, pbf, tile_b=TILE_B, tile_n=TILE_N))
    refbf = reference_forward(x, pbf)
    assert outbf.shape == (N, OUT_DIM)
    assert jnp.allclose(outbf, refbf, atol=1e-2, rtol=1e-2), \
        float(jnp.max(jnp.abs(outbf - refbf)))

    print("KERNEL_OK")
</pallas_src>

<mosaic_0001>
module attributes {stable_mosaic.version = 11 : i64} {
  func.func @dino_head_kernel(%arg0: i32, %arg1: i32, %arg2: memref<128x128xf32, #tpu.memory_space<vmem>>, %arg3: memref<128x256xf32, #tpu.memory_space<vmem>>, %arg4: memref<1x256xf32, #tpu.memory_space<vmem>>, %arg5: memref<256x256xf32, #tpu.memory_space<vmem>>, %arg6: memref<1x256xf32, #tpu.memory_space<vmem>>, %arg7: memref<256x128xf32, #tpu.memory_space<vmem>>, %arg8: memref<1x128xf32, #tpu.memory_space<vmem>>, %arg9: memref<128x128xf32, #tpu.memory_space<vmem>>, %arg10: memref<1x128xf32, #tpu.memory_space<vmem>>, %arg11: memref<128x128xf32, #tpu.memory_space<vmem>>, %arg12: memref<128x128xf32, #tpu.memory_space<vmem>>) attributes {dimension_semantics = [#tpu.dimension_semantics<parallel>, #tpu.dimension_semantics<arbitrary>], iteration_bounds = array<i64: 2, 2>, scalar_prefetch = 0 : i64, scratch_operands = 1 : i64, tpu.core_type = #tpu.core_type<tc>, window_params = [{transform_indices = @transform_0, window_bounds = array<i64: 128, 128>}, {pipeline_mode = #tpu.pipeline_mode<synchronous>, transform_indices = @transform_1, window_bounds = array<i64: 128, 256>}, {pipeline_mode = #tpu.pipeline_mode<synchronous>, transform_indices = @transform_2, window_bounds = array<i64: 1, 256>}, {pipeline_mode = #tpu.pipeline_mode<synchronous>, transform_indices = @transform_3, window_bounds = array<i64: 256, 256>}, {pipeline_mode = #tpu.pipeline_mode<synchronous>, transform_indices = @transform_4, window_bounds = array<i64: 1, 256>}, {pipeline_mode = #tpu.pipeline_mode<synchronous>, transform_indices = @transform_5, window_bounds = array<i64: 256, 128>}, {pipeline_mode = #tpu.pipeline_mode<synchronous>, transform_indices = @transform_6, window_bounds = array<i64: 1, 128>}, {transform_indices = @transform_7, window_bounds = array<i64: 128, 128>}, {transform_indices = @transform_8, window_bounds = array<i64: 1, 128>}, {transform_indices = @transform_9, window_bounds = array<i64: 128, 128>}]} {
    %c0_i32 = arith.constant 0 : i32
    %0 = arith.cmpi eq, %arg1, %c0_i32 : i32
    %1 = arith.extui %0 : i1 to i32
    %c0_i32_0 = arith.constant 0 : i32
    %2 = arith.cmpi ne, %1, %c0_i32_0 : i32
    scf.if %2 {
      %c0_8 = arith.constant 0 : index
      %c0_9 = arith.constant 0 : index
      %10 = vector.load %arg2[%c0_8, %c0_9] : memref<128x128xf32, #tpu.memory_space<vmem>>, vector<128x128xf32>
      %c0_10 = arith.constant 0 : index
      %c0_11 = arith.constant 0 : index
      %11 = vector.load %arg3[%c0_10, %c0_11] : memref<128x256xf32, #tpu.memory_space<vmem>>, vector<128x256xf32>
      %cst_12 = arith.constant dense<0.000000e+00> : vector<128x256xf32>
      %12 = tpu.matmul %10, %11, %cst_12 {dimension_numbers = #tpu.dot_dimension_numbers<[1], [0], [0], [1], [0, 0, 1, 1], [], []>} : vector<128x128xf32>, vector<128x256xf32>, vector<128x256xf32> -> vector<128x256xf32>
      %c0_13 = arith.constant 0 : index
      %c0_14 = arith.constant 0 : index
      %13 = vector.load %arg4[%c0_13, %c0_14] : memref<1x256xf32, #tpu.memory_space<vmem>>, vector<1x256xf32>
      %14 = vector.broadcast %13 : vector<1x256xf32> to vector<128x256xf32>
      %15 = arith.addf %12, %14 : vector<128x256xf32>
      %cst_15 = arith.constant 5.000000e-01 : f32
      %16 = vector.broadcast %cst_15 : f32 to vector<128x256xf32>
      %17 = arith.mulf %16, %15 : vector<128x256xf32>
      %cst_16 = arith.constant 0.707106769 : f32
      %18 = vector.broadcast %cst_16 : f32 to vector<128x256xf32>
      %19 = arith.mulf %15, %18 : vector<128x256xf32>
      %20 = math.erf %19 : vector<128x256xf32>
      %cst_17 = arith.constant 1.000000e+00 : f32
      %21 = vector.broadcast %cst_17 : f32 to vector<128x256xf32>
      %22 = arith.addf %21, %20 : vector<128x256xf32>
      %23 = arith.mulf %17, %22 : vector<128x256xf32>
      %c0_18 = arith.constant 0 : index
      %c0_19 = arith.constant 0 : index
      %24 = vector.load %arg5[%c0_18, %c0_19] : memref<256x256xf32, #tpu.memory_space<vmem>>, vector<256x256xf32>
      %cst_20 = arith.constant dense<0.000000e+00> : vector<128x256xf32>
      %25 = tpu.matmul %23, %24, %cst_20 {dimension_numbers = #tpu.dot_dimension_numbers<[1], [0], [0], [1], [0, 0, 1, 1], [], []>} : vector<128x256xf32>, vector<256x256xf32>, vector<128x256xf32> -> vector<128x256xf32>
      %c0_21 = arith.constant 0 : index
      %c0_22 = arith.constant 0 : index
      %26 = vector.load %arg6[%c0_21, %c0_22] : memref<1x256xf32, #tpu.memory_space<vmem>>, vector<1x256xf32>
      %27 = vector.broadcast %26 : vector<1x256xf32> to vector<128x256xf32>
      %28 = arith.addf %25, %27 : vector<128x256xf32>
      %cst_23 = arith.constant 5.000000e-01 : f32
      %29 = vector.broadcast %cst_23 : f32 to vector<128x256xf32>
      %30 = arith.mulf %29, %28 : vector<128x256xf32>
      %cst_24 = arith.constant 0.707106769 : f32
      %31 = vector.broadcast %cst_24 : f32 to vector<128x256xf32>
      %32 = arith.mulf %28, %31 : vector<128x256xf32>
      %33 = math.erf %32 : vector<128x256xf32>
      %cst_25 = arith.constant 1.000000e+00 : f32
      %34 = vector.broadcast %cst_25 : f32 to vector<128x256xf32>
      %35 = arith.addf %34, %33 : vector<128x256xf32>
      %36 = arith.mulf %30, %35 : vector<128x256xf32>
      %c0_26 = arith.constant 0 : index
      %c0_27 = arith.constant 0 : index
      %37 = vector.load %arg7[%c0_26, %c0_27] : memref<256x128xf32, #tpu.memory_space<vmem>>, vector<256x128xf32>
      %cst_28 = arith.constant dense<0.000000e+00> : vector<128x128xf32>
      %38 = tpu.matmul %36, %37, %cst_28 {dimension_numbers = #tpu.dot_dimension_numbers<[1], [0], [0], [1], [0, 0, 1, 1], [], []>} : vector<128x256xf32>, vector<256x128xf32>, vector<128x128xf32> -> vector<128x128xf32>
      %c0_29 = arith.constant 0 : index
      %c0_30 = arith.constant 0 : index
      %39 = vector.load %arg8[%c0_29, %c0_30] : memref<1x128xf32, #tpu.memory_space<vmem>>, vector<1x128xf32>
      %40 = vector.broadcast %39 : vector<1x128xf32> to vector<128x128xf32>
      %41 = arith.addf %38, %40 : vector<128x128xf32>
      %42 = arith.mulf %41, %41 : vector<128x128xf32>
      %cst_31 = arith.constant dense<0.000000e+00> : vector<128xf32>
      %43 = vector.multi_reduction <add>, %42, %cst_31 [1] : vector<128x128xf32> to vector<128xf32>
      %44 = vector.shape_cast %43 : vector<128xf32> to vector<128x1xf32>
      %cst_32 = arith.constant 1.000000e-24 : f32
      %45 = vector.broadcast %cst_32 : f32 to vector<128x1xf32>
      %46 = arith.maximumf %44, %45 : vector<128x1xf32>
      %47 = math.rsqrt %46 : vector<128x1xf32>
      %48 = vector.broadcast %47 : vector<128x1xf32> to vector<128x128xf32>
      %49 = arith.mulf %41, %48 : vector<128x128xf32>
      %c0_33 = arith.constant 0 : index
      %c0_34 = arith.constant 0 : index
      %50 = vector.load %arg12[%c0_33, %c0_34] : memref<128x128xf32, #tpu.memory_space<vmem>>, vector<128x128xf32>
      tpu.vector_store %arg12[%c0_33, %c0_34], %49 {strides = array<i32>} : memref<128x128xf32, #tpu.memory_space<vmem>>, vector<128x128xf32>,
    } else {
    }
    %c0 = arith.constant 0 : index
    %c0_1 = arith.constant 0 : index
    %3 = vector.load %arg12[%c0, %c0_1] : memref<128x128xf32, #tpu.memory_space<vmem>>, vector<128x128xf32>
    %c0_2 = arith.constant 0 : index
    %c0_3 = arith.constant 0 : index
    %4 = vector.load %arg9[%c0_2, %c0_3] : memref<128x128xf32, #tpu.memory_space<vmem>>, vector<128x128xf32>
    %cst = arith.constant dense<0.000000e+00> : vector<128x128xf32>
    %5 = tpu.matmul %3, %4, %cst {dimension_numbers = #tpu.dot_dimension_numbers<[1], [0], [0], [1], [0, 0, 1, 1], [], []>} : vector<128x128xf32>, vector<128x128xf32>, vector<128x128xf32> -> vector<128x128xf32>
    %c0_4 = arith.constant 0 : index
    %c0_5 = arith.constant 0 : index
    %6 = vector.load %arg10[%c0_4, %c0_5] : memref<1x128xf32, #tpu.memory_space<vmem>>, vector<1x128xf32>
    %7 = vector.broadcast %6 : vector<1x128xf32> to vector<128x128xf32>
    %8 = arith.mulf %5, %7 : vector<128x128xf32>
    %c0_6 = arith.constant 0 : index
    %c0_7 = arith.constant 0 : index
    %9 = vector.load %arg11[%c0_6, %c0_7] : memref<128x128xf32, #tpu.memory_space<vmem>>, vector<128x128xf32>
    tpu.vector_store %arg11[%c0_6, %c0_7], %8 {strides = array<i32>} : memref<128x128xf32, #tpu.memory_space<vmem>>, vector<128x128xf32>,
    return
  }
  func.func @transform_0(%arg0: i32, %arg1: i32) -> (i32, i32) {
    %c0_i32 = arith.constant 0 : i32
    %c0_i32_0 = arith.constant 0 : i32
    return %arg0, %c0_i32 : i32, i32
  }
  func.func @transform_1(%arg0: i32, %arg1: i32) -> (i32, i32) {
    %c0_i32 = arith.constant 0 : i32
    %c0_i32_0 = arith.constant 0 : i32
    %c0_i32_1 = arith.constant 0 : i32
    return %c0_i32, %c0_i32_0 : i32, i32
  }
  func.func @transform_2(%arg0: i32, %arg1: i32) -> (i32, i32) {
    %c0_i32 = arith.constant 0 : i32
    %c0_i32_0 = arith.constant 0 : i32
    %c0_i32_1 = arith.constant 0 : i32
    return %c0_i32, %c0_i32_0 : i32, i32
  }
  func.func @transform_3(%arg0: i32, %arg1: i32) -> (i32, i32) {
    %c0_i32 = arith.constant 0 : i32
    %c0_i32_0 = arith.constant 0 : i32
    %c0_i32_1 = arith.constant 0 : i32
    return %c0_i32, %c0_i32_0 : i32, i32
  }
  func.func @transform_4(%arg0: i32, %arg1: i32) -> (i32, i32) {
    %c0_i32 = arith.constant 0 : i32
    %c0_i32_0 = arith.constant 0 : i32
    %c0_i32_1 = arith.constant 0 : i32
    return %c0_i32, %c0_i32_0 : i32, i32
  }
  func.func @transform_5(%arg0: i32, %arg1: i32) -> (i32, i32) {
    %c0_i32 = arith.constant 0 : i32
    %c0_i32_0 = arith.constant 0 : i32
    %c0_i32_1 = arith.constant 0 : i32
    return %c0_i32, %c0_i32_0 : i32, i32
  }
  func.func @transform_6(%arg0: i32, %arg1: i32) -> (i32, i32) {
    %c0_i32 = arith.constant 0 : i32
    %c0_i32_0 = arith.constant 0 : i32
    %c0_i32_1 = arith.constant 0 : i32
    return %c0_i32, %c0_i32_0 : i32, i32
  }
  func.func @transform_7(%arg0: i32, %arg1: i32) -> (i32, i32) {
    %c0_i32 = arith.constant 0 : i32
    %c0_i32_0 = arith.constant 0 : i32
    return %c0_i32, %arg1 : i32, i32
  }
  func.func @transform_8(%arg0: i32, %arg1: i32) -> (i32, i32) {
    %c0_i32 = arith.constant 0 : i32
    %c0_i32_0 = arith.constant 0 : i32
    return %c0_i32, %arg1 : i32, i32
  }
  func.func @transform_9(%arg0: i32, %arg1: i32) -> (i32, i32) {
    %c0_i32 = arith.constant 0 : i32
    return %arg0, %arg1 : i32, i32
  }
}

</mosaic_0001>

<bundles_post_ra>
// kernel: tpu_custom_call.1
= control target key start
LH: loop header
LB: loop body
LE: loop exit
PB: predicated region body
PF: predicated region fallthrough
CT: control target
= control target key end

     0   :  { %s3898_s0 = inlined_call_operand.hbm [shape: f32[256,128], index: 0, kind: input, shape index: {}]   ;;  %s3899_s1 = inlined_call_operand.hbm [shape: f32[128,256], index: 1, kind: input, shape index: {}]   ;;  %s3900_s2 = inlined_call_operand.vmem [shape: f32[1,256], index: 2, kind: input, shape index: {}]   ;;  %s3901_s3 = inlined_call_operand.hbm [shape: f32[256,256], index: 3, kind: input, shape index: {}]   ;;  %s3902_s4 = inlined_call_operand.vmem [shape: f32[1,256], index: 4, kind: input, shape index: {}]   ;;  %s3903_s5 = inlined_call_operand.hbm [shape: f32[256,128], index: 5, kind: input, shape index: {}]   ;;  %s3904_s6 = inlined_call_operand.vmem [shape: f32[1,128], index: 6, kind: input, shape index: {}]   ;;  %s3905_s7 = inlined_call_operand.hbm [shape: f32[128,256], index: 7, kind: input, shape index: {}]   ;;  %s3906_s8 = inlined_call_operand.vmem [shape: f32[1,256], index: 8, kind: input, shape index: {}]   ;;  %s3907_s9 = inlined_call_operand.hbm [shape: f32[256,256], index: 9, kind: output, shape index: {}]  }
   0x1   :  { %3939 = sst [smem:[#allocation31_spill]] %s3898_s0 }
   0x2   :  { %3940 = sst [smem:[#allocation32_spill]] %s3899_s1 }
   0x3   :  { %3941 = sst [smem:[#allocation33_spill]] %s3900_s2 }
   0x4   :  { %3942 = sst [smem:[#allocation34_spill]] %s3902_s4 }
   0x5   :  { %3943 = sst [smem:[#allocation35_spill]] %s3904_s6 }
   0x6   :  { %3944 = sst [smem:[#allocation36_spill]] %s3906_s8 }
   0x7   :  { %3945 = sst [smem:[#allocation37_spill]] %s3907_s9 }
   0x8   :  { %14 = vsyncpa [#allocation4], 0 }
   0x9   :  { %16 = vsyncpa [#allocation4 + $0x1], 0 }
   0xa   :  { %17 = vsyncpa [#allocation7], 0 }
   0xb   :  { %18 = vsyncpa [#allocation10], 0 }
   0xc   :  { %19 = vsyncpa [#allocation5], 0 }
   0xd   :  { %21 = vsyncpa [#allocation5 + $0x1], 0  ;;  %s3003_s30 = smov 0   ;;  %s3005_s10 = smov 0  }
   0xe   :  { %s3007_s11 = smov 0   ;;  %s3009_s12 = smov 0  }
   0xf   :  { %s3011_s13 = smov 0   ;;  %s3013_s14 = smov 0  }
  0x10   :  { %s3015_s15 = smov 0   ;;  %s3017_s16 = smov 0  }
  0x11   :  { %s3019_s17 = smov 0   ;;  %s3021_s18 = smov 0  }
  0x12   :  { %s3023_s19 = smov 0   ;;  %s3025_s20 = smov 0  }
  0x13   :  { %s3027_s21 = smov 0   ;;  %s3029_s22 = smov 0  }
  0x14 LB: > { %3946 = sst [smem:[#allocation18_spill]] %s2885_s30  ;;  %s3070_s23 = sadd.s32 4294967295, %s2937_s22   ;;  %s2937_s22 = sphi %s3029_s22, %s27_s22   ;;  %s2933_s21 = sphi %s3027_s21, %s4012_s21   ;;  %s2929_s20 = sphi %s3025_s20, %s4023_s20   ;;  %s2925_s19 = sphi %s3023_s19, %s4010_s19   ;;  %s2921_s18 = sphi %s3021_s18, %s4022_s18   ;;  %s2917_s17 = sphi %s3019_s17, %s4021_s17   ;;  %s2913_s16 = sphi %s3017_s16, %s4020_s16   ;;  %s2909_s15 = sphi %s3015_s15, %s4019_s15   ;;  %s2905_s14 = sphi %s3013_s14, %s4018_s14   ;;  %s2901_s13 = sphi %s3011_s13, %s4017_s13   ;;  %s2897_s12 = sphi %s3009_s12, %s4008_s12   ;;  %s2893_s11 = sphi %s3007_s11, %s4016_s11   ;;  %s2889_s10 = sphi %s3005_s10, %s4015_s10   ;;  %s2885_s30 = sphi %s3003_s30, %s4014_s30  }
  0x15   : > { %3947 = sst [smem:[#allocation19_spill]] %s2889_s10  ;;  %s1916_s24 = sadd.s32 4294967294, %s2937_s22  }
  0x16   : > { %3948 = sst [smem:[#allocation20_spill]] %s2901_s13  ;;  %p59_p0 = scmp.ne.s32.totalorder %s2913_s16, %s2909_s15 }
  0x17   : > { %3949 = sst [smem:[#allocation21_spill]] %s2921_s18  ;;  %p3913_p1 = scmp.eq.s32.totalorder %s3070_s23, 0 }
  0x18   : > { %3950 = sst [smem:[#allocation22_spill]] %s2925_s19  ;;  %p211_p3 = scmp.ne.s32.totalorder %s2901_s13, %s2897_s12 }
  0x19   : > { %3951 = sst [smem:[#allocation23_spill]] %s2933_s21  ;;  %p3080_p4 = por %p3913_p1, %p59_p0 }
  0x1a   : > { %p262_p5 = scmp.ne.s32.totalorder %s2893_s11, %s2889_s10  ;;  %p3088_p6 = por %p211_p3, %p3913_p1 }
  0x1b   : > { %s3952_s25 = scalar_select %p3080_p4, 1, 0 }
  0x1c   : > { %s3954_s26 = scalar_select %p3088_p6, 1, 0 }
  0x1d   : > { %3953 = sst [smem:[#allocation24_spill]] %s3952_s25  ;;  %p263_p7 = scmp.eq.s32.totalorder %s3070_s23, 3 }
  0x1e   : > { %3955 = sst [smem:[#allocation25_spill]] %s3954_s26  ;;  %p268_p8 = scmp.ne.s32.totalorder %s2889_s10, %s2885_s30 }
  0x1f   : > { %p269_p9 = scmp.eq.s32.totalorder %s1916_s24, 3  ;;  %p3095_p10 = por %p263_p7, %p262_p5 }
  0x20   : > { %p1917_p11 = scmp.ge.s32.totalorder %s2937_s22, 1  ;;  %p276_p13 = scmp.lt.s32.totalorder %s2937_s22, 5 }
  0x21   : > { %s3956_s27 = scalar_select %p3095_p10, 1, 0 }
  0x22   : > { %p3100_p12 = por %p269_p9, %p268_p8  ;;  %p3105_p0 = pnand %p1917_p11, %p276_p13 }
  0x23   : > { %3957 = sst [smem:[#allocation26_spill]] %s3956_s27  ;;  %s2939_s12 = smov [#allocation6]  }
  0x24   : > { %s3958_s28 = scalar_select %p3100_p12, 1, 0 }
  0x25   : > { %s3960_s29 = scalar_select %p3105_p0, 1, 0 }
  0x26   : > { %3959 = sst [smem:[#allocation27_spill]] %s3958_s28  ;;  %s288_s15 = sshll.u32 %s2939_s12, 4  ;;  %s289_s15 = int_to_ptr.vmem [resolvable:$true] %s288_s15 }
  0x27   : > { %p2323_p3 = pneg %p3105_p0  ;;  %s3962_s1 = sld [smem:[#allocation32_spill]] }
  0x29   : > { %p3113_p5 = pnand %p2323_p3, %p3913_p1 }
  0x2b   : > { %s3961_s24 = scalar_select %p3113_p5, 1, 0 }
  0x2c   : > { %p3125_p8 = pneg %p3113_p5 }
  0x2d   : > { %s2635_s28 = scalar_lea.hbm %s3962_s1, 4096 }
  0x2e   : > { %p2636_p7 = scmp.ne.s32.totalorder %s3962_s1, %s2635_s28  ;;  %p2642_p13 = scmp.lt.u32.totalorder %s2635_s28, %s3962_s1 }
  0x30   : > { %p2638_p9 = pnand %p3125_p8, %p2636_p7 }
  0x32   : > { %p2639_p11 = pneg %p2638_p9 }
  0x34   : > { %p2644_p3 = pnand %p2642_p13, %p2639_p11 }
  0x36   : > { %2647 = shalt.err (!%p2644_p3)
}
  0x37   : > { %s2648_s30 = scalar_lea.vmem %s289_s15, 4096  ;;  %p2656_p10 = scmp.lt.s32.totalorder %s289_s15, %s289_s15 }
  0x38   : > { %p2649_p1 = scmp.ne.s32.totalorder %s289_s15, %s2648_s30  ;;  %p2657_p6 = scmp.lt.s32.totalorder %s2648_s30, %s2648_s30 }
  0x3a   : > { %p2651_p2 = pnand %p2649_p1, %p3125_p8  ;;  %p2658_p4 = por %p2657_p6, %p2656_p10 }
  0x3c   : > { %p2652_p12 = pneg %p2651_p2 }
  0x3e   : > { %p2659_p0 = pnand %p2658_p4, %p2652_p12 }
  0x40   : > { %2662 = shalt.err (!%p2659_p0)
}
  0x41   : > { %s3918_s9 = smov 256   ;;  %s3920_s4 = smov 16  }
  0x42   : > { %2326 = dma.hbm_to_vmem [thread:$0]  (!%p3113_p5), %s3962_s1, 4096, %s289_s15, [#allocation7], %s3918_s9, %s3918_s9, %s3920_s4  }
  0x43   : > { %s36_s27 = sadd.s32 1, %s2929_s20  ;;  %s39_s28 = sadd.s32 1, %s2933_s21 }
  0x44   : > { %p37_p1 = scmp.ge.s32.totalorder %s36_s27, 2  ;;  %s46_s30 = sadd.s32 1, %s2917_s17 }
  0x45   : > { %p53_p2 = scmp.ne.s32.totalorder %s2917_s17, %s2913_s16  ;;  %p54_p4 = scmp.eq.s32.totalorder %s2937_s22, 0 }
  0x46   : > { %s4025_s27 = smov (%p37_p1, %s36_s27), 0  ;;  %s4027_s28 = smov (!%p37_p1, %s39_s28), %s2933_s21 }
  0x47   : > { %3964 = sst [smem:[#allocation28_spill]] %s4025_s27  ;;  %s195_s6 = ssub.s32 %s2929_s20, %s4025_s27 }
  0x48   : > { %p41_p6 = scmp.ge.s32.totalorder %s4027_s28, 2  ;;  %p196_p10 = scmp.eq.s32.totalorder %s195_s6, 0 }
  0x49   : > { %p3155_p12 = por %p54_p4, %p53_p2  ;;  %s198_s19 = sadd.s32 1, %s2905_s14 }
  0x4a   : > { %s4029_s28 = smov (%p41_p6, %s4027_s28), 0  ;;  %p3968_p0 = scmp.ne.s32.totalorder %s2905_s14, %s2901_s13 }
  0x4b   : > { %3966 = sst [smem:[#allocation29_spill]] %s4029_s28  ;;  %s43_s4 = ssub.s32 %s2933_s21, %s4029_s28 }
  0x4c   : > { %s3163_s9 = scalar_select %p196_p10, %s2905_s14, %s198_s19  }
  0x4d   : > { %p3170_p7 = por %p3968_p0, %p54_p4  ;;  %p44_p9 = scmp.eq.s32.totalorder %s43_s4, 0 }
  0x4e   : > { %3967 = sst [smem:[#allocation30_spill]] %s3163_s9  ;;  %s249_s27 = sor.u32 %s195_s6, %s43_s4 }
  0x4f   : > { %p250_p11 = scmp.eq.s32.totalorder %s249_s27, 0  ;;  %s252_s2 = sadd.s32 1, %s2893_s11 }
  0x50   : > { %s3176_s8 = scalar_select %p44_p9, %s2917_s17, %s46_s30  }
  0x51   : > { %s3179_s18 = scalar_select %p250_p11, %s2893_s11, %s252_s2  }
  0x52   : > { %p2347_p13 = scmp.lt.s32.totalorder %s2937_s22, 4  ;;  %s337_s10 = sand.u32 1, %s2937_s22  }
  0x53   : > { %s339_s19 = sand.u32 1, %s2917_s17   ;;  %s1943_s28 = sshll.u32 %s2933_s21, 11 }
  0x54   : > { %s1922_s9 = sshll.u32 %s339_s19, 7  ;;  %s3970_s0 = sld [smem:[#allocation31_spill]] }
  0x55   : > { %s341_s4 = scalar_lea.vmem [#allocation3], %s1922_s9  ;;  %p3192_p3 = pnand %p2347_p13, %p3155_p12 }
  0x56   : > { %s348_s27 = sshll.u32 %s341_s4, 4  ;;  %p3200_p1 = pnand %p2347_p13, %p3170_p7  ;;  %s3196_s27 = int_to_ptr.vmem [resolvable:$true] %s348_s27 }
  0x57   : > { %s3204_s26 = scalar_lea.sflag [#allocation4], %s337_s10  ;;  %p2665_p4 = pneg %p3192_p3 }
  0x58   : > { %s3972_s13 = scalar_select %p3200_p1, 1, 0 }
  0x5a   : > { %s3188_s25 = scalar_lea.hbm %s3970_s0, %s1943_s28  ;;  %s2668_s6 = scalar_lea.hbm %s3970_s0, 4096 }
  0x5b   : > { %s2663_s28 = scalar_lea.hbm %s3188_s25, 2048  ;;  %p2669_p12 = scmp.lt.u32.totalorder %s3188_s25, %s3970_s0 }
  0x5c   : > { %p2664_p2 = scmp.ne.s32.totalorder %s3188_s25, %s2663_s28  ;;  %p2670_p0 = scmp.lt.u32.totalorder %s2668_s6, %s2663_s28 }
  0x5d   : > { %p2672_p9 = scmp.lt.u32.totalorder %s2663_s28, %s3188_s25 }
  0x5e   : > { %p2666_p6 = pnand %p2665_p4, %p2664_p2  ;;  %p2671_p7 = por %p2670_p0, %p2669_p12 }
  0x60   : > { %p2667_p10 = pneg %p2666_p6  ;;  %p2673_p11 = por %p2672_p9, %p2671_p7 }
  0x62   : > { %p2674_p13 = pnand %p2673_p11, %p2667_p10 }
  0x64   : > { %2677 = shalt.err (!%p2674_p13)
}
  0x65   : > { %s2678_s10 = scalar_lea.vmem %s3196_s27, 2048  ;;  %s2942_s19 = smov [#allocation3]  }
  0x66   : > { %p2679_p2 = scmp.ne.s32.totalorder %s3196_s27, %s2678_s10  ;;  %s2683_s4 = sshll.u32 %s2942_s19, 4  ;;  %s2684_s4 = int_to_ptr.vmem [resolvable:$false] %s2683_s4 }
  0x67   : > { %s2685_s9 = scalar_lea.vmem %s2684_s4, 4096  ;;  %p2686_p5 = scmp.lt.s32.totalorder %s3196_s27, %s2684_s4 }
  0x68   : > { %p2681_p6 = pnand %p2679_p2, %p2665_p4  ;;  %p2687_p12 = scmp.lt.s32.totalorder %s2685_s9, %s2678_s10 }
  0x6a   : > { %p2682_p1 = pneg %p2681_p6  ;;  %p2688_p0 = por %p2687_p12, %p2686_p5 }
  0x6c   : > { %p2689_p7 = pnand %p2688_p0, %p2682_p1 }
  0x6e   : > { %2692 = shalt.err (!%p2689_p7)
}
  0x6f   : > { %s3934_s28 = smov 128   ;;  %s3936_s30 = smov 8  }
  0x70   : > { %2336 = dma.hbm_to_vmem [thread:$0]  (!%p3192_p3), %s3188_s25, 2048, %s3196_s27, %s3204_s26, %s3934_s28, %s3934_s28, %s3936_s30  }
  0x71   : > { %s2945_s6 = smov [#allocation8]   ;;  %s2693_s19 = scalar_lea.hbm %s3901_s3, 8192 }
  0x72   : > { %s304_s15 = sshll.u32 %s2945_s6, 4  ;;  %p2694_p5 = scmp.ne.s32.totalorder %s3901_s3, %s2693_s19  ;;  %s305_s15 = int_to_ptr.vmem [resolvable:$true] %s304_s15 }
  0x73   : > { %p2700_p10 = scmp.lt.u32.totalorder %s2693_s19, %s3901_s3 }
  0x74   : > { %p2696_p1 = pnand %p2694_p5, %p3125_p8 }
  0x76   : > { %p2697_p4 = pneg %p2696_p1 }
  0x78   : > { %p2702_p9 = pnand %p2700_p10, %p2697_p4 }
  0x7a   : > { %2705 = shalt.err (!%p2702_p9)
}
  0x7b   : > { %s2706_s25 = scalar_lea.vmem %s305_s15, 8192  ;;  %p2714_p2 = scmp.lt.s32.totalorder %s305_s15, %s305_s15 }
  0x7c   : > { %p2707_p3 = scmp.ne.s32.totalorder %s305_s15, %s2706_s25  ;;  %p2715_p6 = scmp.lt.s32.totalorder %s2706_s25, %s2706_s25 }
  0x7e   : > { %p2709_p11 = pnand %p2707_p3, %p3125_p8  ;;  %p2716_p12 = por %p2715_p6, %p2714_p2 }
  0x80   : > { %p2710_p13 = pneg %p2709_p11 }
  0x82   : > { %p2717_p0 = pnand %p2716_p12, %p2710_p13 }
  0x84   : > { %2720 = shalt.err (!%p2717_p0)
}
  0x85   : > { %p3973_p7 = scmp.ne.s32.totalorder %s3961_s24, 0  ;;  %s3974_s27 = smov 16  }
  0x86   : > { %s3975_s6 = smov 256   ;;  %s2946_s10 = smov [#allocation9]  }
  0x87   : > { %2329 = dma.hbm_to_vmem [thread:$0]  (!%p3973_p7), %s3901_s3, 8192, %s305_s15, [#allocation7], %s3975_s6, %s3975_s6, %s3974_s27  }
  0x88   : > { %s320_s19 = sshll.u32 %s2946_s10, 4  ;;  %s360_s4 = sand.u32 1, %s2905_s14   ;;  %s321_s19 = int_to_ptr.vmem [resolvable:$true] %s320_s19 }
  0x89   : > { %s1925_s9 = sshll.u32 %s360_s4, 7  ;;  %s2721_s28 = scalar_lea.hbm %s3903_s5, 4096 }
  0x8a   : > { %p2722_p5 = scmp.ne.s32.totalorder %s3903_s5, %s2721_s28  ;;  %p2728_p10 = scmp.lt.u32.totalorder %s2721_s28, %s3903_s5 }
  0x8c   : > { %p2724_p1 = pnand %p2722_p5, %p3125_p8 }
  0x8e   : > { %p2725_p4 = pneg %p2724_p1 }
  0x90   : > { %p2730_p9 = pnand %p2728_p10, %p2725_p4 }
  0x92   : > { %2733 = shalt.err (!%p2730_p9)
}
  0x93   : > { %s2734_s15 = scalar_lea.vmem %s321_s19, 4096  ;;  %p2742_p2 = scmp.lt.s32.totalorder %s321_s19, %s321_s19 }
  0x94   : > { %p2735_p3 = scmp.ne.s32.totalorder %s321_s19, %s2734_s15  ;;  %p2743_p6 = scmp.lt.s32.totalorder %s2734_s15, %s2734_s15 }
  0x96   : > { %p2737_p11 = pnand %p2735_p3, %p3125_p8  ;;  %p2744_p12 = por %p2743_p6, %p2742_p2 }
  0x98   : > { %p2738_p13 = pneg %p2737_p11 }
  0x9a   : > { %p2745_p0 = pnand %p2744_p12, %p2738_p13 }
  0x9c   : > { %2748 = shalt.err (!%p2745_p0)
}
  0x9d   : > { %s3976_s21 = smov 8   ;;  %s3977_s30 = smov 128  }
  0x9e   : > { %2332 = dma.hbm_to_vmem [thread:$0]  (!%p3973_p7), %s3903_s5, 4096, %s321_s19, [#allocation10], %s3977_s30, %s3977_s30, %s3976_s21  }
  0x9f   : > { %s1926_s12 = sshll.u32 %s2929_s20, 7  ;;  %s362_s24 = scalar_lea.vmem [#allocation11], %s1925_s9 }
  0xa0   : > { %s3282_s2 = scalar_lea.hbm %s3905_s7, %s1926_s12  ;;  %s368_s25 = sshll.u32 %s362_s24, 4  ;;  %s3284_s25 = int_to_ptr.vmem [resolvable:$true] %s368_s25 }
  0xa1   : > { %s2749_s0 = scalar_lea.hbm %s3282_s2, 2048  ;;  %p3978_p5 = scmp.ne.s32.totalorder %s3972_s13, 0 }
  0xa2   : > { %p2750_p8 = scmp.ne.s32.totalorder %s3282_s2, %s2749_s0  ;;  %s2754_s15 = scalar_lea.hbm %s3905_s7, 4096 }
  0xa3   : > { %p2751_p1 = pneg %p3978_p5  ;;  %p2755_p10 = scmp.lt.u32.totalorder %s3282_s2, %s3905_s7 }
  0xa4   : > { %p2756_p9 = scmp.lt.u32.totalorder %s2754_s15, %s2749_s0  ;;  %p2758_p11 = scmp.lt.u32.totalorder %s2749_s0, %s3282_s2 }
  0xa5   : > { %p2752_p7 = pnand %p2751_p1, %p2750_p8 }
  0xa6   : > { %p2757_p3 = por %p2756_p9, %p2755_p10 }
  0xa7   : > { %p2753_p4 = pneg %p2752_p7 }
  0xa8   : > { %p2759_p13 = por %p2758_p11, %p2757_p3 }
  0xaa   : > { %p2760_p2 = pnand %p2759_p13, %p2753_p4 }
  0xac   : > { %2763 = shalt.err (!%p2760_p2)
}
  0xad   : > { %s2764_s9 = scalar_lea.vmem %s3284_s25, 2048  ;;  %s2947_s12 = smov [#allocation11]  }
  0xae   : > { %p2765_p6 = scmp.ne.s32.totalorder %s3284_s25, %s2764_s9  ;;  %s2769_s10 = sshll.u32 %s2947_s12, 4  ;;  %s2770_s10 = int_to_ptr.vmem [resolvable:$false] %s2769_s10 }
  0xaf   : > { %s2771_s4 = scalar_lea.vmem %s2770_s10, 4096  ;;  %p2772_p8 = scmp.lt.s32.totalorder %s3284_s25, %s2770_s10 }
  0xb0   : > { %p2767_p12 = pnand %p2765_p6, %p2751_p1  ;;  %p2773_p7 = scmp.lt.s32.totalorder %s2771_s4, %s2764_s9 }
  0xb2   : > { %p2768_p0 = pneg %p2767_p12  ;;  %p2774_p10 = por %p2773_p7, %p2772_p8 }
  0xb4   : > { %p2775_p9 = pnand %p2774_p10, %p2768_p0 }
  0xb6   : > { %2778 = shalt.err (!%p2775_p9)
}
  0xb7   : > { %2339 = dma.hbm_to_vmem [thread:$0]  (!%p3978_p5), %s3282_s2, 2048, %s3284_s25, %s3204_s26, %s3975_s6, %s3977_s30, %s3976_s21  }
  0xb8   : > { %p3979_p1 = scmp.ne.s32.totalorder %s3960_s29, 0 }
  0xb9   : > { %s3980_s24 = sld [smem:[#allocation24_spill]] (!%p3979_p1)  ;;  %s388_s0 = sand.u32 (!%p3979_p1), 1, %s3070_s23  }
  0xba   : > { %386 = sbr.rel (%p3979_p1) target bundleno = 1435 (0x59b), region = 56  ;;  %s390_s19 = sand.u32 (!%p3979_p1), 1, %s2913_s16  }
  0xbb   : > { %s1928_s1 = sshll.u32 (!%p3979_p1), %s390_s19, 7  ;;  %s389_s15 = scalar_lea.sflag (!%p3979_p1), [#allocation4], %s388_s0 }
  0xbc   : > { %s3319_s27 = scalar_lea.vmem (!%p3979_p1), [#allocation3], %s1928_s1 }
  0xbf   : > { %p3981_p4 = scmp.ne.s32.totalorder (!%p3979_p1), %s3980_s24, 0 }
  0xc1   : > { %2864 = dma.done.wait (%p3981_p4), %s389_s15, 2048  }
  0xc2   : > { %2866 = vsyncadd (%p3981_p4), %s389_s15, 4294965248  ;;  %p3982_p3 = scmp.eq.s32.totalorder %s3070_s23, 0 }
  0xc4   : > { %2868 = dma.done.wait (%p3982_p3), [#allocation7], 12288   ;;  %p3983_p5 = pmov %p3982_p3 }
  0xc5   : > { %p3984_p11 = pmov %p3982_p3 }
  0xc6   : > { %2870 = vsyncadd (%p3983_p5), [#allocation7], 4294955008 }
  0xc7   : > { %2872 = dma.done.wait (%p3984_p11), [#allocation10], 4096   ;;  %p3985_p13 = pmov %p3982_p3 }
  0xc8   : > { %s3986_s29 = sld [smem:[#allocation20_spill]]  ;;  %s3987_s13 = sld [smem:[#allocation25_spill]] }
  0xc9   : > { %2874 = vsyncadd (%p3985_p13), [#allocation10], 4294963200 }
  0xce   : > { %s411_s26 = sand.u32 1, %s3986_s29   ;;  %p3988_p2 = scmp.ne.s32.totalorder %s3987_s13, 0 }
  0xcf   : > { %s1932_s6 = sshll.u32 %s411_s26, 7 }
  0xd0   : > { %s3334_s21 = scalar_lea.vmem [#allocation11], %s1932_s6 }
  0xd1   : > { %2876 = dma.done.wait (%p3988_p2), %s389_s15, 2048  }
  0xd2   : > { %2878 = vsyncadd (%p3988_p2), %s389_s15, 4294965248  ;;  %s3989_s30 = sld [smem:[#allocation19_spill]]  ;;  %s3990_s2 = sld [smem:[#allocation21_spill]] }
  0xd3   : > { %s3991_s10 = sld [smem:[#allocation36_spill]] }
  0xd8   : > { %s453_s25 = sand.u32 1, %s3989_s30   ;;  %p457_p6 = scmp.lt.s32.totalorder %s3990_s2, 1 }
  0xd9   : > { %s1933_s23 = sshll.u32 %s453_s25, 7  ;;  %p1934_p12 = scmp.ne.s32.totalorder %s3990_s2, 0 }
  0xda   : > { %s3345_s28 = scalar_select %p457_p6, %s3990_s2, 1 }
  0xdb   : > { %s3351_s24 = scalar_lea.vmem [#allocation12], %s1933_s23  ;;  %464 = sbr.rel (%p1934_p12) target bundleno = 1157 (0x485), region = 80  ;;  %v482_v0 = vld [vmem:[#allocation6 + $0x8] sm:$0xff] (!%p1934_p12)  ;;  %v484_v1 = vld [vmem:[#allocation6 + $0x18] sm:$0xff] (!%p1934_p12)  ;;  %v481_v2 = vld [vmem:[#allocation6] sm:$0xff] (!%p1934_p12)  ;;  %v2948_v7 = vmov (!%p1934_p12), 0.0  }
  0xdc   : > { %s459_s4 = scalar_lea.vmem %s3991_s10, %s3345_s28  ;;  %v2113_v3 = vpack.c.bf16 (!%p1934_p12), %v484_v1, %v482_v0  ;;  %v483_v4 = vld [vmem:[#allocation6 + $0x10] sm:$0xff] (!%p1934_p12)  ;;  %v486_v5 = vld [vmem:[#allocation6 + $0x28] sm:$0xff] (!%p1934_p12)  ;;  %v488_v6 = vld [vmem:[#allocation6 + $0x38] sm:$0xff] (!%p1934_p12)  ;;  %589 = vmatprep.mubr.f32.mxu0 (!%p1934_p12), %v2948_v7  ;;  %s3992_s1 = sld [smem:[#allocation33_spill]] (!%p1934_p12) }
  0xdd   : > { %v2115_v8 = vpack.c.bf16 (!%p1934_p12), %v483_v4, %v481_v2  ;;  %v2117_v9 = vpack.c.bf16 (!%p1934_p12), %v488_v6, %v486_v5  ;;  %v485_v10 = vld [vmem:[#allocation6 + $0x20] sm:$0xff] (!%p1934_p12)  ;;  %v487_v11 = vld [vmem:[#allocation6 + $0x30] sm:$0xff] (!%p1934_p12)  ;;  %v490_v12 = vld [vmem:[#allocation6 + $0x48] sm:$0xff] (!%p1934_p12)  ;;  %s3993_s29 = sld [smem:[#allocation34_spill]] (!%p1934_p12)  ;;  %s3994_s6 = sld [smem:[#allocation35_spill]] (!%p1934_p12) }
  0xde   : > { %2114 = vmatprep.subr.bf16.mxu0 (!%p1934_p12), %v2113_v3  ;;  %v492_v13 = vld [vmem:[#allocation6 + $0x58] sm:$0xff] (!%p1934_p12)  ;;  %v2119_v14 = vpack.c.bf16 (!%p1934_p12), %v487_v11, %v485_v10  ;;  %v489_v16 = vld [vmem:[#allocation6 + $0x40] sm:$0xff] (!%p1934_p12)  ;;  %v491_v17 = vld [vmem:[#allocation6 + $0x50] sm:$0xff] (!%p1934_p12) }
  0xdf   : > { %2116 = vmatpush1.bf16.msra.mxu0 (!%p1934_p12), %v2115_v8  ;;  %v2121_v15 = vpack.c.bf16 (!%p1934_p12), %v492_v13, %v490_v12  ;;  %v494_v18 = vld [vmem:[#allocation6 + $0x68] sm:$0xff] (!%p1934_p12)  ;;  %v496_v19 = vld [vmem:[#allocation6 + $0x78] sm:$0xff] (!%p1934_p12)  ;;  %v2123_v20 = vpack.c.bf16 (!%p1934_p12), %v491_v17, %v489_v16  ;;  %v493_v22 = vld [vmem:[#allocation6 + $0x60] sm:$0xff] (!%p1934_p12) }
  0xe0   : > { %2118 = vmatprep.subr.bf16.mxu0 (!%p1934_p12), %v2117_v9  ;;  %v2125_v21 = vpack.c.bf16 (!%p1934_p12), %v496_v19, %v494_v18  ;;  %v495_v23 = vld [vmem:[#allocation6 + $0x70] sm:$0xff] (!%p1934_p12)  ;;  %v498_v24 = vld [vmem:[#allocation6 + $0x88] sm:$0xff] (!%p1934_p12)  ;;  %v500_v25 = vld [vmem:[#allocation6 + $0x98] sm:$0xff] (!%p1934_p12) }
  0xe1   : > { %v2127_v26 = vpack.c.bf16 (!%p1934_p12), %v495_v23, %v493_v22  ;;  %v2129_v27 = vpack.c.bf16 (!%p1934_p12), %v500_v25, %v498_v24  ;;  %v497_v28 = vld [vmem:[#allocation6 + $0x80] sm:$0xff] (!%p1934_p12)  ;;  %v499_v29 = vld [vmem:[#allocation6 + $0x90] sm:$0xff] (!%p1934_p12)  ;;  %v502_v30 = vld [vmem:[#allocation6 + $0xa8] sm:$0xff] (!%p1934_p12) }
  0xe2   : > { %v504_v31 = vld [vmem:[#allocation6 + $0xb8] sm:$0xff]  ;;  %v501_v32 = vld [vmem:[#allocation6 + $0xa0] sm:$0xff]  ;;  %v503_v33 = vld [vmem:[#allocation6 + $0xb0] sm:$0xff]  ;;  %v2131_v34 = vpack.c.bf16 %v499_v29, %v497_v28 }
  0xe3   : > { %2120 = vmatpush1.bf16.msra.mxu0 %v2119_v14  ;;  %v506_v35 = vld [vmem:[#allocation6 + $0xc8] sm:$0xff]  ;;  %v508_v36 = vld [vmem:[#allocation6 + $0xd8] sm:$0xff]  ;;  %v846_v39 = vld [vmem:[#allocation8] sm:$0xff]  ;;  %v2133_v40 = vpack.c.bf16 %v504_v31, %v502_v30  ;;  %v2135_v51 = vpack.c.bf16 %v503_v33, %v501_v32 }
  0xe4   : > { %2122 = vmatprep.subr.bf16.mxu0 %v2121_v15  ;;  %v847_v37 = vld [vmem:[#allocation8 + $0x8] sm:$0xff]  ;;  %v849_v38 = vld [vmem:[#allocation8 + $0x18] sm:$0xff]  ;;  %v848_v42 = vld [vmem:[#allocation8 + $0x10] sm:$0xff]  ;;  %v2137_v55 = vpack.c.bf16 %v508_v36, %v506_v35 }
  0xe5   : > { %v2145_v41 = vpack.c.bf16 %v849_v38, %v847_v37  ;;  %v851_v43 = vld [vmem:[#allocation8 + $0x28] sm:$0xff]  ;;  %v853_v44 = vld [vmem:[#allocation8 + $0x38] sm:$0xff]  ;;  %v2147_v45 = vpack.c.bf16 %v848_v42, %v846_v39  ;;  %v850_v47 = vld [vmem:[#allocation8 + $0x20] sm:$0xff] }
  0xe6   : > { %v2149_v46 = vpack.c.bf16 %v853_v44, %v851_v43  ;;  %v852_v48 = vld [vmem:[#allocation8 + $0x30] sm:$0xff]  ;;  %v855_v49 = vld [vmem:[#allocation8 + $0x48] sm:$0xff]  ;;  %v857_v50 = vld [vmem:[#allocation8 + $0x58] sm:$0xff] }
  0xe7   : > { %2124 = vmatpush1.bf16.msra.mxu0 %v2123_v20  ;;  %2146 = vmatprep.subr.bf16.mxu1 %v2145_v41  ;;  %v505_v52 = vld [vmem:[#allocation6 + $0xc0] sm:$0xff]  ;;  %v507_v53 = vld [vmem:[#allocation6 + $0xd0] sm:$0xff]  ;;  %v2151_v54 = vpack.c.bf16 %v852_v48, %v850_v47  ;;  %v510_v56 = vld [vmem:[#allocation6 + $0xe8] sm:$0xff]  ;;  %v2153_v57 = vpack.c.bf16 %v857_v50, %v855_v49 }
  0xe8   : > { %2126 = vmatprep.subr.bf16.mxu0 %v2125_v21  ;;  %2148 = vmatpush1.bf16.msra.mxu1 %v2147_v45  ;;  %v854_v58 = vld [vmem:[#allocation8 + $0x40] sm:$0xff]  ;;  %v856_v59 = vld [vmem:[#allocation8 + $0x50] sm:$0xff]  ;;  %v512_v60 = vld [vmem:[#allocation6 + $0xf8] sm:$0xff]  ;;  %v2139_v63 = vpack.c.bf16 %v507_v53, %v505_v52 }
  0xe9   : > { %2150 = vmatprep.subr.bf16.mxu1 %v2149_v46  ;;  %v859_v61 = vld [vmem:[#allocation8 + $0x68] sm:$0xff]  ;;  %v861_v62 = vld [vmem:[#allocation8 + $0x78] sm:$0xff]  ;;  %v509_v0 = vld [vmem:[#allocation6 + $0xe0] sm:$0xff]  ;;  %v2155_v1 = vpack.c.bf16 %v856_v59, %v854_v58  ;;  %v2141_v2 = vpack.c.bf16 %v512_v60, %v510_v56 }
  0xea   : > { %v511_v3 = vld [vmem:[#allocation6 + $0xf0] sm:$0xff]  ;;  %v2157_v4 = vpack.c.bf16 %v861_v62, %v859_v61  ;;  %v858_v5 = vld [vmem:[#allocation8 + $0x60] sm:$0xff]  ;;  %v863_v8 = vld [vmem:[#allocation8 + $0x88] sm:$0xff] }
  0xeb   : > { %2128 = vmatpush1.bf16.msra.mxu0 %v2127_v26  ;;  %v860_v6 = vld [vmem:[#allocation8 + $0x70] sm:$0xff]  ;;  %v865_v9 = vld [vmem:[#allocation8 + $0x98] sm:$0xff]  ;;  %v2143_v10 = vpack.c.bf16 %v511_v3, %v509_v0  ;;  %v862_v13 = vld [vmem:[#allocation8 + $0x80] sm:$0xff] }
  0xec   : > { %2130 = vmatprep.subr.bf16.mxu0 %v2129_v27  ;;  %2152 = vmatpush1.bf16.msra.mxu1 %v2151_v54  ;;  %v2159_v11 = vpack.c.bf16 %v860_v6, %v858_v5  ;;  %v2161_v12 = vpack.c.bf16 %v865_v9, %v863_v8  ;;  %v864_v14 = vld [vmem:[#allocation8 + $0x90] sm:$0xff]  ;;  %v867_v15 = vld [vmem:[#allocation8 + $0xa8] sm:$0xff]  ;;  %v869_v16 = vld [vmem:[#allocation8 + $0xb8] sm:$0xff] }
  0xed   : > { %2154 = vmatprep.subr.bf16.mxu1 %v2153_v57  ;;  %v465_v17 = vld [vmem:[%s3319_s27] sm:$0xff]  ;;  %v2163_v18 = vpack.c.bf16 %v864_v14, %v862_v13  ;;  %v2165_v19 = vpack.c.bf16 %v869_v16, %v867_v15  ;;  %v868_v21 = vld [vmem:[#allocation8 + $0xb0] sm:$0xff]  ;;  %v871_v22 = vld [vmem:[#allocation8 + $0xc8] sm:$0xff] }
  0xee   : > { %v866_v20 = vld [vmem:[#allocation8 + $0xa0] sm:$0xff]  ;;  %v873_v23 = vld [vmem:[#allocation8 + $0xd8] sm:$0xff]  ;;  %v466_v24 = vld [vmem:[%s3319_s27 + $0x8] sm:$0xff] }
  0xef   : > { %2132 = vmatpush1.bf16.msra.mxu0 %v2131_v34  ;;  %v2167_v25 = vpack.c.bf16 %v868_v21, %v866_v20  ;;  %v2169_v26 = vpack.c.bf16 %v873_v23, %v871_v22  ;;  %v870_v27 = vld [vmem:[#allocation8 + $0xc0] sm:$0xff]  ;;  %v872_v28 = vld [vmem:[#allocation8 + $0xd0] sm:$0xff]  ;;  %v875_v29 = vld [vmem:[#allocation8 + $0xe8] sm:$0xff] }
  0xf0   : > { %2134 = vmatprep.subr.bf16.mxu0 %v2133_v40  ;;  %2156 = vmatpush1.bf16.msra.mxu1 %v2155_v1  ;;  %v877_v30 = vld [vmem:[#allocation8 + $0xf8] sm:$0xff]  ;;  %v467_v31 = vld [vmem:[%s3319_s27 + $0x10] sm:$0xff]  ;;  %v2171_v32 = vpack.c.bf16 %v872_v28, %v870_v27  ;;  %v874_v34 = vld [vmem:[#allocation8 + $0xe0] sm:$0xff] }
  0xf1   : > { %2158 = vmatprep.subr.bf16.mxu1 %v2157_v4  ;;  %v2173_v33 = vpack.c.bf16 %v877_v30, %v875_v29  ;;  %v876_v35 = vld [vmem:[#allocation8 + $0xf0] sm:$0xff]  ;;  %v879_v36 = vld [vmem:[#allocation8 + $0x108] sm:$0xff]  ;;  %v881_v37 = vld [vmem:[#allocation8 + $0x118] sm:$0xff] }
  0xf2   : > { %v468_v38 = vld [vmem:[%s3319_s27 + $0x18] sm:$0xff]  ;;  %v2175_v39 = vpack.c.bf16 %v876_v35, %v874_v34  ;;  %v2177_v40 = vpack.c.bf16 %v881_v37, %v879_v36  ;;  %v878_v41 = vld [vmem:[#allocation8 + $0x100] sm:$0xff]  ;;  %v880_v42 = vld [vmem:[#allocation8 + $0x110] sm:$0xff] }
  0xf3   : > { %2136 = vmatpush1.bf16.msra.mxu0 %v2135_v51  ;;  %v883_v43 = vld [vmem:[#allocation8 + $0x128] sm:$0xff]  ;;  %v885_v44 = vld [vmem:[#allocation8 + $0x138] sm:$0xff]  ;;  %v469_v45 = vld [vmem:[%s3319_s27 + $0x20] sm:$0xff]  ;;  %v2179_v46 = vpack.c.bf16 %v880_v42, %v878_v41 }
  0xf4   : > { %2138 = vmatprep.subr.bf16.mxu0 %v2137_v55  ;;  %2160 = vmatpush1.bf16.msra.mxu1 %v2159_v11  ;;  %v2181_v47 = vpack.c.bf16 %v885_v44, %v883_v43  ;;  %v882_v48 = vld [vmem:[#allocation8 + $0x120] sm:$0xff]  ;;  %v884_v49 = vld [vmem:[#allocation8 + $0x130] sm:$0xff]  ;;  %v887_v50 = vld [vmem:[#allocation8 + $0x148] sm:$0xff] }
  0xf5   : > { %2162 = vmatprep.subr.bf16.mxu1 %v2161_v12  ;;  %v889_v51 = vld [vmem:[#allocation8 + $0x158] sm:$0xff]  ;;  %v470_v52 = vld [vmem:[%s3319_s27 + $0x28] sm:$0xff]  ;;  %v2183_v53 = vpack.c.bf16 %v884_v49, %v882_v48  ;;  %v886_v55 = vld [vmem:[#allocation8 + $0x140] sm:$0xff] }
  0xf6   : > { %v2185_v54 = vpack.c.bf16 %v889_v51, %v887_v50  ;;  %v888_v56 = vld [vmem:[#allocation8 + $0x150] sm:$0xff]  ;;  %v472_v59 = vld [vmem:[%s3319_s27 + $0x38] sm:$0xff]  ;;  %v473_v60 = vld [vmem:[%s3319_s27 + $0x40] sm:$0xff] }
  0xf7   : > { %2140 = vmatpush1.bf16.msra.mxu0 %v2139_v63  ;;  %v471_v57 = vld [vmem:[%s3319_s27 + $0x30] sm:$0xff]  ;;  %v2187_v58 = vpack.c.bf16 %v888_v56, %v886_v55  ;;  %v474_v61 = vld [vmem:[%s3319_s27 + $0x48] sm:$0xff]  ;;  %v476_v63 = vld [vmem:[%s3319_s27 + $0x58] sm:$0xff] }
  0xf8   : > { %2142 = vmatprep.subr.bf16.mxu0 %v2141_v2  ;;  %2164 = vmatpush1.bf16.msra.mxu1 %v2163_v18  ;;  %v475_v62 = vld [vmem:[%s3319_s27 + $0x50] sm:$0xff]  ;;  %v477_v0 = vld [vmem:[%s3319_s27 + $0x60] sm:$0xff]  ;;  %v478_v1 = vld [vmem:[%s3319_s27 + $0x68] sm:$0xff] }
  0xf9   : > { %2166 = vmatprep.subr.bf16.mxu1 %v2165_v19  ;;  %v479_v2 = vld [vmem:[%s3319_s27 + $0x70] sm:$0xff]  ;;  %v480_v3 = vld [vmem:[%s3319_s27 + $0x78] sm:$0xff]  ;;  %v891_v4 = vld [vmem:[#allocation8 + $0x168] sm:$0xff] }
  0xfa   : > { %v893_v5 = vld [vmem:[#allocation8 + $0x178] sm:$0xff]  ;;  %v890_v8 = vld [vmem:[#allocation8 + $0x160] sm:$0xff]  ;;  %v892_v9 = vld [vmem:[#allocation8 + $0x170] sm:$0xff] }
  0xfb   : > { %2144 = vmatpush1.bf16.msra.mxu0 %v2143_v10  ;;  %v2189_v6 = vpack.c.bf16 %v893_v5, %v891_v4  ;;  %v2191_v10 = vpack.c.bf16 %v892_v9, %v890_v8  ;;  %v895_v11 = vld [vmem:[#allocation8 + $0x188] sm:$0xff]  ;;  %v897_v12 = vld [vmem:[#allocation8 + $0x198] sm:$0xff]  ;;  %v894_v14 = vld [vmem:[#allocation8 + $0x180] sm:$0xff] }
  0xfc   : > { %2168 = vmatpush1.bf16.msra.mxu1 %v2167_v25  ;;  %v2193_v13 = vpack.c.bf16 %v897_v12, %v895_v11  ;;  %v896_v15 = vld [vmem:[#allocation8 + $0x190] sm:$0xff]  ;;  %v898_v19 = vld [vmem:[#allocation8 + $0x1a0] sm:$0xff]  ;;  %v903_v22 = vld [vmem:[#allocation8 + $0x1c8] sm:$0xff] }
  0xfd   : > { %2170 = vmatprep.subr.bf16.mxu1 %v2169_v26  ;;  %v2195_v16 = vpack.c.bf16 %v896_v15, %v894_v14  ;;  %v900_v20 = vld [vmem:[#allocation8 + $0x1b0] sm:$0xff]  ;;  %v905_v23 = vld [vmem:[#allocation8 + $0x1d8] sm:$0xff]  ;;  %v902_v25 = vld [vmem:[#allocation8 + $0x1c0] sm:$0xff] }
  0xfe   : > { %590 = vmatmul.mubr.f32.vlgmr.msra.gmra.mrb[0].mxu0 %v465_v17  ;;  %v899_v17 = vld [vmem:[#allocation8 + $0x1a8] sm:$0xff]  ;;  %v2199_v21 = vpack.c.bf16 %v900_v20, %v898_v19  ;;  %v904_v26 = vld [vmem:[#allocation8 + $0x1d0] sm:$0xff]  ;;  %v909_v29 = vld [vmem:[#allocation8 + $0x1f8] sm:$0xff] }
  0xff   : > { %595 = vmatprep.mubr.f32.mxu0 %v2948_v7  ;;  %v2203_v27 = vpack.c.bf16 %v904_v26, %v902_v25  ;;  %v907_v28 = vld [vmem:[#allocation8 + $0x1e8] sm:$0xff]  ;;  %v1259_v34 = vld [vmem:[#allocation9 + $0x80] sm:$0xff]  ;;  %v1245_v43 = vld [vmem:[#allocation9 + $0x10] sm:$0xff] }
 0x100   : > { %2172 = vmatpush1.bf16.msra.mxu1 %v2171_v32  ;;  %v2205_v30 = vpack.c.bf16 %v909_v29, %v907_v28  ;;  %v908_v32 = vld [vmem:[#allocation8 + $0x1f0] sm:$0xff]  ;;  %v1260_v35 = vld [vmem:[#allocation9 + $0x88] sm:$0xff]  ;;  %v1243_v36 = vld [vmem:[#allocation9] sm:$0xff] }
 0x101   : > { %2174 = vmatprep.subr.bf16.mxu1 %v2173_v33  ;;  %v2209_v37 = vpack.c.bf16 %v1260_v35, %v1259_v34  ;;  %v1246_v44 = vld [vmem:[#allocation9 + $0x18] sm:$0xff]  ;;  %v1247_v49 = vld [vmem:[#allocation9 + $0x20] sm:$0xff]  ;;  %v1248_v50 = vld [vmem:[#allocation9 + $0x28] sm:$0xff] }
 0x102   : > { %596 = vmatmul.mubr.f32.gmra.mrb[2].mxu0 %v466_v24  ;;  %v2201_v24 = vpack.c.bf16 %v905_v23, %v903_v22  ;;  %v1265_v51 = vld [vmem:[#allocation9 + $0xb0] sm:$0xff]  ;;  %v1250_v56 = vld [vmem:[#allocation9 + $0x38] sm:$0xff] }
 0x103   : > { %601 = vmatprep.mubr.f32.mxu0 %v2948_v7  ;;  %2210 = vmatprep.subr.bf16.mxu0 %v2209_v37  ;;  %v1249_v55 = vld [vmem:[#allocation9 + $0x30] sm:$0xff] }
 0x104   : > { %2176 = vmatpush1.bf16.msra.mxu1 %v2175_v39  ;;  %v1261_v39 = vld [vmem:[#allocation9 + $0x90] sm:$0xff] }
 0x105   : > { %2178 = vmatprep.subr.bf16.mxu1 %v2177_v40  ;;  %v1262_v40 = vld [vmem:[#allocation9 + $0x98] sm:$0xff] }
 0x106   : > { %602 = vmatmul.mubr.f32.gmra.mrb[4].mxu0 %v467_v31  ;;  %v906_v31 = vld [vmem:[#allocation8 + $0x1e0] sm:$0xff]  ;;  %v3388_v42 = vpack.c.bf16 %v1262_v40, %v1261_v39 }
 0x107   : > { %607 = vmatprep.mubr.f32.mxu0 %v2948_v7  ;;  %v2207_v33 = vpack.c.bf16 %v908_v32, %v906_v31 }
 0x108   : > { %2180 = vmatpush1.bf16.msra.mxu1 %v2179_v46  ;;  %v1264_v46 = vld [vmem:[#allocation9 + $0xa8] sm:$0xff] }
 0x109   : > { %2182 = vmatprep.subr.bf16.mxu1 %v2181_v47  ;;  %v3391_v47 = vpack.c.bf16 %v1246_v44, %v1245_v43 }
 0x10a   : > { %608 = vmatmul.mubr.f32.gmra.mrb[6].mxu0 %v468_v38  ;;  %v1244_v38 = vld [vmem:[#allocation9 + $0x8] sm:$0xff] }
 0x10b   : > { %613 = vmatprep.mubr.f32.mxu0 %v2948_v7  ;;  %v3386_v41 = vpack.c.bf16 %v1244_v38, %v1243_v36 }
 0x10c   : > { %2184 = vmatpush1.bf16.msra.mxu1 %v2183_v53  ;;  %v3397_v53 = vpack.c.bf16 %v1248_v50, %v1247_v49 }
 0x10d   : > { %2186 = vmatprep.subr.bf16.mxu1 %v2185_v54  ;;  %2212 = vmatpush3.bf16.msra.mxu0 %v3386_v41 }
 0x10e   : > { %614 = vmatmul.mubr.f32.gmra.mrb[8].mxu0 %v469_v45  ;;  %v1263_v45 = vld [vmem:[#allocation9 + $0xa0] sm:$0xff]  ;;  %2214 = vmatprep.subr.bf16.mxu0 %v3388_v42 }
 0x10f   : > { %619 = vmatprep.mubr.f32.mxu0 %v2948_v7  ;;  %v3394_v48 = vpack.c.bf16 %v1264_v46, %v1263_v45 }
 0x110   : > { %2188 = vmatpush1.bf16.msra.mxu1 %v2187_v58  ;;  %v1268_v58 = vld [vmem:[#allocation9 + $0xc8] sm:$0xff] }
 0x111   : > { %2190 = vmatprep.subr.bf16.mxu1 %v2189_v6  ;;  %2216 = vmatpush3.bf16.msra.mxu0 %v3391_v47 }
 0x112   : > { %620 = vmatmul.mubr.f32.gmra.mrb[10].mxu0 %v470_v52  ;;  %v1266_v52 = vld [vmem:[#allocation9 + $0xb8] sm:$0xff]  ;;  %2218 = vmatprep.subr.bf16.mxu0 %v3394_v48 }
 0x113   : > { %625 = vmatprep.mubr.f32.mxu0 %v2948_v7  ;;  %v3400_v54 = vpack.c.bf16 %v1266_v52, %v1265_v51 }
 0x114   : > { %2192 = vmatpush1.bf16.msra.mxu1 %v2191_v10 }
 0x115   : > { %2194 = vmatprep.subr.bf16.mxu1 %v2193_v13  ;;  %2220 = vmatpush3.bf16.msra.mxu0 %v3397_v53 }
 0x116   : > { %626 = vmatmul.mubr.f32.gmra.mrb[12].mxu0 %v471_v57  ;;  %v1267_v57 = vld [vmem:[#allocation9 + $0xc0] sm:$0xff]  ;;  %2222 = vmatprep.subr.bf16.mxu0 %v3400_v54 }
 0x117   : > { %631 = vmatprep.mubr.f32.mxu0 %v2948_v7 }
 0x118   : > { %2196 = vmatpush1.bf16.msra.mxu1 %v2195_v16 }
 0x11a   : > { %632 = vmatmul.mubr.f32.gmra.mrb[14].mxu0 %v472_v59  ;;  %v3403_v59 = vpack.c.bf16 %v1250_v56, %v1249_v55 }
 0x11b   : > { %637 = vmatprep.mubr.f32.mxu0 %v2948_v7 }
 0x11c   : > { %2224 = vmatpush3.bf16.msra.mxu0 %v3403_v59 }
 0x11e   : > { %638 = vmatmul.mubr.f32.gmra.mrb[16].mxu0 %v473_v60  ;;  %v3406_v60 = vpack.c.bf16 %v1268_v58, %v1267_v57 }
 0x11f   : > { %643 = vmatprep.mubr.f32.mxu0 %v2948_v7 }
 0x120   : > { %2226 = vmatprep.subr.bf16.mxu0 %v3406_v60 }
 0x122   : > { %644 = vmatmul.mubr.f32.gmra.mrb[18].mxu0 %v474_v61  ;;  %v1251_v61 = vld [vmem:[#allocation9 + $0x40] sm:$0xff] }
 0x123   : > { %649 = vmatprep.mubr.f32.mxu0 %v2948_v7 }
 0x126   : > { %650 = vmatmul.mubr.f32.gmra.mrb[20].mxu0 %v475_v62  ;;  %v1252_v62 = vld [vmem:[#allocation9 + $0x48] sm:$0xff] }
 0x127   : > { %655 = vmatprep.mubr.f32.mxu0 %v2948_v7 }
 0x12a   : > { %656 = vmatmul.mubr.f32.gmra.mrb[22].mxu0 %v476_v63  ;;  %v3409_v63 = vpack.c.bf16 %v1252_v62, %v1251_v61 }
 0x12b   : > { %661 = vmatprep.mubr.f32.mxu0 %v2948_v7 }
 0x12c   : > { %2228 = vmatpush3.bf16.msra.mxu0 %v3409_v63 }
 0x12e   : > { %662 = vmatmul.mubr.f32.gmra.mrb[24].mxu0 %v477_v0  ;;  %v515_v0 = vlaneseq }
 0x12f   : > { %667 = vmatprep.mubr.f32.mxu0 %v2948_v7 }
 0x132   : > { %668 = vmatmul.mubr.f32.gmra.mrb[26].mxu0 %v478_v1  ;;  %v3413_v1 = vshrl.u32 %v515_v0, 7 }
 0x133   : > { %673 = vmatprep.mubr.f32.mxu0 %v2948_v7 }
 0x134   : > { %v521_v4 = vsub.s32 1, %v3413_v1 }
 0x136   : > { %674 = vmatmul.mubr.f32.gmra.mrb[28].mxu0 %v479_v2  ;;  %v517_v2 = vsub.s32 0, %v3413_v1 }
 0x137   : > { %679 = vmatprep.mubr.f32.mxu0 %v2948_v7  ;;  %v901_v7 = vld [vmem:[#allocation8 + $0x1b8] sm:$0xff] }
 0x138   : > { %v2197_v18 = vpack.c.bf16 %v901_v7, %v899_v17 }
 0x13a   : > { %680 = vmatmul.mubr.f32.gmra.mrb[30].mxu0 %v480_v3  ;;  %2198 = vmatprep.subr.bf16.mxu1 %v2197_v18  ;;  %v513_v3 = vld [vmem:[%s3992_s1] sm:$0x3] }
 0x13b   : > { %2200 = vmatpush1.bf16.msra.mxu1 %v2199_v21  ;;  %v3422_v5 = vrot.slane %v513_v3, %v517_v2  ;;  %v3426_v6 = vrot.slane %v513_v3, %v521_v4 }
 0x13c   : > { %2202 = vmatprep.subr.bf16.mxu1 %v2201_v24 }
 0x13f   : > { %2204 = vmatpush1.bf16.msra.mxu1 %v2203_v27 }
 0x140   : > { %2206 = vmatprep.subr.bf16.mxu1 %v2205_v30 }
 0x143   : > { %2208 = vmatpush1.bf16.msra.mxu1 %v2207_v33 }
 0x144   : > { %2273 = vmatprep.subr.bf16.mxu1 %v2209_v37 }
 0x1d1   : > { %v591_v8 = vpop.f32.mrb[0].mxu0 }
 0x1d2   : > { %v592_v9 = vadd.f32 %v591_v8, %v3422_v5  ;;  %v593_v10 = vpop.f32.mrb[1].mxu0 }
 0x1d3   : > { %v594_v11 = vadd.f32 %v593_v10, %v3426_v6 }
 0x1d4   : > { %v718_v12 = vmul.f32 0.70710677, %v592_v9  ;;  %v686_v39 = vmul.f32 0.5, %v592_v9 }
 0x1d5   : > { %v719_v13 = vmul.f32 0.70710677, %v594_v11  ;;  %v597_v14 = vpop.f32.mrb[2].mxu0  ;;  %v687_v37 = vmul.f32 0.5, %v594_v11 }
 0x1d6   : > { %2475 = verf.f32 %v718_v12  ;;  %v598_v15 = vadd.f32 %v597_v14, %v3422_v5  ;;  %v599_v16 = vpop.f32.mrb[3].mxu0 }
 0x1d7   : > { %2477 = verf.f32 %v719_v13  ;;  %v600_v17 = vadd.f32 %v599_v16, %v3426_v6 }
 0x1d8   : > { %v720_v7 = vmul.f32 0.70710677, %v598_v15  ;;  %v688_v61 = vmul.f32 0.5, %v598_v15 }
 0x1d9   : > { %v721_v18 = vmul.f32 0.70710677, %v600_v17  ;;  %v603_v19 = vpop.f32.mrb[4].mxu0  ;;  %v689_v55 = vmul.f32 0.5, %v600_v17 }
 0x1da   : > { %2479 = verf.f32 %v720_v7  ;;  %v604_v20 = vadd.f32 %v603_v19, %v3422_v5  ;;  %v605_v21 = vpop.f32.mrb[5].mxu0 }
 0x1db   : > { %2481 = verf.f32 %v721_v18  ;;  %v606_v22 = vadd.f32 %v605_v21, %v3426_v6 }
 0x1dc   : > { %v722_v23 = vmul.f32 0.70710677, %v604_v20  ;;  %v690_v7 = vmul.f32 0.5, %v604_v20 }
 0x1dd   : > { %v723_v24 = vmul.f32 0.70710677, %v606_v22  ;;  %v609_v25 = vpop.f32.mrb[6].mxu0  ;;  %v691_v14 = vmul.f32 0.5, %v606_v22 }
 0x1de   : > { %2483 = verf.f32 %v722_v23  ;;  %v3435_v26 = vadd.f32 %v609_v25, %v3422_v5  ;;  %v611_v27 = vpop.f32.mrb[7].mxu0 }
 0x1df   : > { %2485 = verf.f32 %v723_v24  ;;  %v612_v28 = vadd.f32 %v611_v27, %v3426_v6 }
 0x1e0   : > { %v2476_v29 = vpop.eup %2475  ;;  %v724_v30 = vmul.f32 0.70710677, %v3435_v26 }
 0x1e1   : > { %v2478_v31 = vpop.eup %2477  ;;  %v782_v32 = vadd.f32 1.0, %v2476_v29  ;;  %v725_v33 = vmul.f32 0.70710677, %v612_v28  ;;  %v615_v34 = vpop.f32.mrb[8].mxu0  ;;  %v693_v20 = vmul.f32 0.5, %v612_v28 }
 0x1e2   : > { %2487 = verf.f32 %v724_v30  ;;  %v3440_v35 = vadd.f32 %v615_v34, %v3422_v5  ;;  %v617_v36 = vpop.f32.mrb[9].mxu0  ;;  %v783_v38 = vadd.f32 1.0, %v2478_v31  ;;  %v692_v31 = vmul.f32 0.5, %v3435_v26 }
 0x1e3   : > { %2489 = verf.f32 %v725_v33  ;;  %v3443_v40 = vadd.f32 %v617_v36, %v3426_v6  ;;  %v814_v52 = vmul.f32 %v782_v32, %v686_v39 }
 0x1e4   : > { %v2480_v43 = vpop.eup %2479  ;;  %v726_v44 = vmul.f32 0.70710677, %v3440_v35  ;;  %v815_v45 = vmul.f32 %v783_v38, %v687_v37 }
 0x1e5   : > { %v2482_v46 = vpop.eup %2481  ;;  %v784_v49 = vadd.f32 1.0, %v2480_v43  ;;  %v727_v50 = vmul.f32 0.70710677, %v3443_v40  ;;  %v621_v51 = vpop.f32.mrb[10].mxu0  ;;  %v695_v26 = vmul.f32 0.5, %v3443_v40 }
 0x1e6   : > { %v785_v56 = vadd.f32 1.0, %v2482_v46  ;;  %2491 = verf.f32 %v726_v44  ;;  %v3448_v57 = vadd.f32 %v621_v51, %v3422_v5  ;;  %v623_v58 = vpop.f32.mrb[11].mxu0  ;;  %986 = vmatprep.mubr.f32.mxu1 %v815_v45  ;;  %v694_v45 = vmul.f32 0.5, %v3440_v35 }
 0x1e7   : > { %2493 = verf.f32 %v727_v50  ;;  %v3451_v62 = vadd.f32 %v623_v58, %v3426_v6  ;;  %987 = vmatmul.mubr.f32.vlgmr.msra.gmra.mrb[0].mxu1 %v814_v52  ;;  %v816_v13 = vmul.f32 %v784_v49, %v688_v61 }
 0x1e8   : > { %v2484_v0 = vpop.eup %2483  ;;  %v728_v3 = vmul.f32 0.70710677, %v3448_v57  ;;  %v817_v8 = vmul.f32 %v785_v56, %v689_v55  ;;  %2281 = vmatpush3.bf16.msra.mxu1 %v3386_v41 }
 0x1e9   : > { %v2486_v9 = vpop.eup %2485  ;;  %v786_v10 = vadd.f32 1.0, %v2484_v0  ;;  %v729_v11 = vmul.f32 0.70710677, %v3451_v62  ;;  %v627_v12 = vpop.f32.mrb[12].mxu0  ;;  %2274 = vmatprep.subr.bf16.mxu1 %v3388_v42  ;;  %v697_v35 = vmul.f32 0.5, %v3451_v62  ;;  %v696_v0 = vmul.f32 0.5, %v3448_v57 }
 0x1ea   : > { %v787_v15 = vadd.f32 1.0, %v2486_v9  ;;  %2495 = verf.f32 %v728_v3  ;;  %v3458_v16 = vadd.f32 %v627_v12, %v3422_v5  ;;  %v629_v17 = vpop.f32.mrb[13].mxu0  ;;  %992 = vmatprep.mubr.f32.mxu1 %v817_v8 }
 0x1eb   : > { %2497 = verf.f32 %v729_v11  ;;  %v3461_v41 = vadd.f32 %v629_v17, %v3426_v6  ;;  %993 = vmatmul.mubr.f32.gmra.mrb[2].mxu1 %v816_v13  ;;  %v818_v25 = vmul.f32 %v786_v10, %v690_v7 }
 0x1ec   : > { %v2488_v18 = vpop.eup %2487  ;;  %v730_v19 = vmul.f32 0.70710677, %v3458_v16  ;;  %v819_v21 = vmul.f32 %v787_v15, %v691_v14  ;;  %2282 = vmatpush3.bf16.msra.mxu1 %v3391_v47  ;;  %v698_v17 = vmul.f32 0.5, %v3458_v16 }
 0x1ed   : > { %v2490_v42 = vpop.eup %2489  ;;  %v788_v22 = vadd.f32 1.0, %v2488_v18  ;;  %v731_v23 = vmul.f32 0.70710677, %v3461_v41  ;;  %v633_v24 = vpop.f32.mrb[14].mxu0  ;;  %2275 = vmatprep.subr.bf16.mxu1 %v3394_v48  ;;  %v699_v13 = vmul.f32 0.5, %v3461_v41 }
 0x1ee   : > { %v789_v27 = vadd.f32 1.0, %v2490_v42  ;;  %2499 = verf.f32 %v730_v19  ;;  %v3468_v29 = vadd.f32 %v633_v24, %v3422_v5  ;;  %v635_v30 = vpop.f32.mrb[15].mxu0  ;;  %998 = vmatprep.mubr.f32.mxu1 %v819_v21 }
 0x1ef   : > { %2501 = verf.f32 %v731_v23  ;;  %v3472_v47 = vadd.f32 %v635_v30, %v3426_v6  ;;  %999 = vmatmul.mubr.f32.gmra.mrb[4].mxu1 %v818_v25  ;;  %v820_v38 = vmul.f32 %v788_v22, %v692_v31 }
 0x1f0   : > { %v2492_v32 = vpop.eup %2491  ;;  %v732_v33 = vmul.f32 0.70710677, %v3468_v29  ;;  %v821_v34 = vmul.f32 %v789_v27, %v693_v20  ;;  %2283 = vmatpush3.bf16.msra.mxu1 %v3397_v53  ;;  %v700_v27 = vmul.f32 0.5, %v3468_v29 }
 0x1f1   : > { %v2494_v48 = vpop.eup %2493  ;;  %v790_v28 = vadd.f32 1.0, %v2492_v32  ;;  %v733_v36 = vmul.f32 0.70710677, %v3472_v47  ;;  %v639_v37 = vpop.f32.mrb[16].mxu0  ;;  %2276 = vmatprep.subr.bf16.mxu1 %v3400_v54  ;;  %v701_v24 = vmul.f32 0.5, %v3472_v47 }
 0x1f2   : > { %v791_v39 = vadd.f32 1.0, %v2494_v48  ;;  %2503 = verf.f32 %v732_v33  ;;  %v3480_v43 = vadd.f32 %v639_v37, %v3422_v5  ;;  %v641_v44 = vpop.f32.mrb[17].mxu0  ;;  %1004 = vmatprep.mubr.f32.mxu1 %v821_v34 }
 0x1f3   : > { %2505 = verf.f32 %v733_v36  ;;  %v3484_v53 = vadd.f32 %v641_v44, %v3426_v6  ;;  %1005 = vmatmul.mubr.f32.gmra.mrb[6].mxu1 %v820_v38  ;;  %v822_v55 = vmul.f32 %v790_v28, %v694_v45 }
 0x1f4   : > { %v2496_v46 = vpop.eup %2495  ;;  %v734_v49 = vmul.f32 0.70710677, %v3480_v43  ;;  %v823_v54 = vmul.f32 %v791_v39, %v695_v26  ;;  %2284 = vmatpush3.bf16.msra.mxu1 %v3403_v59  ;;  %v702_v39 = vmul.f32 0.5, %v3480_v43 }
 0x1f5   : > { %v2498_v40 = vpop.eup %2497  ;;  %v792_v50 = vadd.f32 1.0, %v2496_v46  ;;  %v735_v51 = vmul.f32 0.70710677, %v3484_v53  ;;  %v645_v52 = vpop.f32.mrb[18].mxu0  ;;  %2277 = vmatprep.subr.bf16.mxu1 %v3406_v60  ;;  %v703_v37 = vmul.f32 0.5, %v3484_v53 }
 0x1f6   : > { %v793_v56 = vadd.f32 1.0, %v2498_v40  ;;  %2507 = verf.f32 %v734_v49  ;;  %v3492_v58 = vadd.f32 %v645_v52, %v3422_v5  ;;  %v647_v61 = vpop.f32.mrb[19].mxu0  ;;  %1010 = vmatprep.mubr.f32.mxu1 %v823_v54 }
 0x1f7   : > { %2509 = verf.f32 %v735_v51  ;;  %v3496_v59 = vadd.f32 %v647_v61, %v3426_v6  ;;  %1011 = vmatmul.mubr.f32.gmra.mrb[8].mxu1 %v822_v55  ;;  %v824_v12 = vmul.f32 %v792_v50, %v696_v0 }
 0x1f8   : > { %v2500_v3 = vpop.eup %2499  ;;  %v736_v8 = vmul.f32 0.70710677, %v3492_v58  ;;  %v825_v60 = vmul.f32 %v793_v56, %v697_v35  ;;  %2285 = vmatpush3.bf16.msra.mxu1 %v3409_v63  ;;  %v704_v56 = vmul.f32 0.5, %v3492_v58 }
 0x1f9   : > { %v2502_v62 = vpop.eup %2501  ;;  %v794_v9 = vadd.f32 1.0, %v2500_v3  ;;  %v737_v10 = vmul.f32 0.70710677, %v3496_v59  ;;  %v651_v11 = vpop.f32.mrb[20].mxu0  ;;  %v705_v52 = vmul.f32 0.5, %v3496_v59 }
 0x1fa   : > { %v795_v57 = vadd.f32 1.0, %v2502_v62  ;;  %2511 = verf.f32 %v736_v8  ;;  %v3503_v14 = vadd.f32 %v651_v11, %v3422_v5  ;;  %v653_v15 = vpop.f32.mrb[21].mxu0  ;;  %1016 = vmatprep.mubr.f32.mxu1 %v825_v60 }
 0x1fb   : > { %2513 = verf.f32 %v737_v10  ;;  %v3507_v63 = vadd.f32 %v653_v15, %v3426_v6  ;;  %1017 = vmatmul.mubr.f32.gmra.mrb[10].mxu1 %v824_v12  ;;  %v826_v23 = vmul.f32 %v794_v9, %v698_v17 }
 0x1fc   : > { %v2504_v7 = vpop.eup %2503  ;;  %v738_v18 = vmul.f32 0.70710677, %v3503_v14  ;;  %v827_v19 = vmul.f32 %v795_v57, %v699_v13  ;;  %v706_v57 = vmul.f32 0.5, %v3503_v14 }
 0x1fd   : > { %v2506_v21 = vpop.eup %2505  ;;  %v796_v41 = vadd.f32 1.0, %v2504_v7  ;;  %v739_v42 = vmul.f32 0.70710677, %v3507_v63  ;;  %v657_v22 = vpop.f32.mrb[22].mxu0  ;;  %v707_v11 = vmul.f32 0.5, %v3507_v63 }
 0x1fe   : > { %v797_v25 = vadd.f32 1.0, %v2506_v21  ;;  %2515 = verf.f32 %v738_v18  ;;  %v3513_v16 = vadd.f32 %v657_v22, %v3422_v5  ;;  %v659_v20 = vpop.f32.mrb[23].mxu0  ;;  %1022 = vmatprep.mubr.f32.mxu1 %v827_v19 }
 0x1ff   : > { %2517 = verf.f32 %v739_v42  ;;  %v3517_v30 = vadd.f32 %v659_v20, %v3426_v6  ;;  %1023 = vmatmul.mubr.f32.gmra.mrb[12].mxu1 %v826_v23  ;;  %v828_v36 = vmul.f32 %v796_v41, %v700_v27 }
 0x200   : > { %v2508_v31 = vpop.eup %2507  ;;  %v740_v32 = vmul.f32 0.70710677, %v3513_v16  ;;  %v829_v33 = vmul.f32 %v797_v25, %v701_v24  ;;  %v708_v14 = vmul.f32 0.5, %v3513_v16 }
 0x201   : > { %v2510_v34 = vpop.eup %2509  ;;  %v798_v47 = vadd.f32 1.0, %v2508_v31  ;;  %v741_v48 = vmul.f32 0.70710677, %v3517_v30  ;;  %v663_v28 = vpop.f32.mrb[24].mxu0  ;;  %v709_v22 = vmul.f32 0.5, %v3517_v30 }
 0x202   : > { %v799_v38 = vadd.f32 1.0, %v2510_v34  ;;  %2519 = verf.f32 %v740_v32  ;;  %v3523_v29 = vadd.f32 %v663_v28, %v3422_v5  ;;  %v665_v26 = vpop.f32.mrb[25].mxu0  ;;  %1028 = vmatprep.mubr.f32.mxu1 %v829_v33 }
 0x203   : > { %2521 = verf.f32 %v741_v48  ;;  %v3527_v44 = vadd.f32 %v665_v26, %v3426_v6  ;;  %1029 = vmatmul.mubr.f32.gmra.mrb[14].mxu1 %v828_v36  ;;  %v830_v51 = vmul.f32 %v798_v47, %v702_v39 }
 0x204   : > { %v2512_v45 = vpop.eup %2511  ;;  %v742_v46 = vmul.f32 0.70710677, %v3523_v29  ;;  %v831_v49 = vmul.f32 %v799_v38, %v703_v37 }
 0x205   : > { %v2514_v54 = vpop.eup %2513  ;;  %v800_v53 = vadd.f32 1.0, %v2512_v45  ;;  %v743_v40 = vmul.f32 0.70710677, %v3527_v44  ;;  %v669_v50 = vpop.f32.mrb[26].mxu0  ;;  %v711_v30 = vmul.f32 0.5, %v3527_v44 }
 0x206   : > { %v801_v55 = vadd.f32 1.0, %v2514_v54  ;;  %2523 = verf.f32 %v742_v46  ;;  %v3533_v43 = vadd.f32 %v669_v50, %v3422_v5  ;;  %v671_v35 = vpop.f32.mrb[27].mxu0  ;;  %1034 = vmatprep.mubr.f32.mxu1 %v831_v49 }
 0x207   : > { %2525 = verf.f32 %v743_v40  ;;  %v672_v61 = vadd.f32 %v671_v35, %v3426_v6  ;;  %1035 = vmatmul.mubr.f32.gmra.mrb[16].mxu1 %v830_v51  ;;  %v832_v10 = vmul.f32 %v800_v53, %v704_v56 }
 0x208   : > { %v2516_v0 = vpop.eup %2515  ;;  %v744_v3 = vmul.f32 0.70710677, %v3533_v43  ;;  %v833_v8 = vmul.f32 %v801_v55, %v705_v52  ;;  %v712_v45 = vmul.f32 0.5, %v3533_v43 }
 0x209   : > { %v2518_v60 = vpop.eup %2517  ;;  %v802_v62 = vadd.f32 1.0, %v2516_v0  ;;  %v745_v59 = vmul.f32 0.70710677, %v672_v61  ;;  %v675_v9 = vpop.f32.mrb[28].mxu0  ;;  %v713_v26 = vmul.f32 0.5, %v672_v61 }
 0x20a   : > { %v803_v12 = vadd.f32 1.0, %v2518_v60  ;;  %2527 = verf.f32 %v744_v3  ;;  %v676_v13 = vadd.f32 %v675_v9, %v3422_v5  ;;  %v677_v58 = vpop.f32.mrb[29].mxu0  ;;  %1040 = vmatprep.mubr.f32.mxu1 %v833_v8  ;;  %v1269_v60 = vld [vmem:[#allocation9 + $0xd0] sm:$0xff] }
 0x20b   : > { %2529 = verf.f32 %v745_v59  ;;  %v678_v15 = vadd.f32 %v677_v58, %v3426_v6  ;;  %1041 = vmatmul.mubr.f32.gmra.mrb[18].mxu1 %v832_v10  ;;  %v834_v63 = vmul.f32 %v802_v62, %v706_v57  ;;  %v1270_v62 = vld [vmem:[#allocation9 + $0xd8] sm:$0xff]  ;;  %v1253_v9 = vld [vmem:[#allocation9 + $0x50] sm:$0xff]  ;;  %v1255_v57 = vld [vmem:[#allocation9 + $0x60] sm:$0xff] }
 0x20c   : > { %v2520_v17 = vpop.eup %2519  ;;  %v746_v7 = vmul.f32 0.70710677, %v676_v13  ;;  %v835_v18 = vmul.f32 %v803_v12, %v707_v11  ;;  %v714_v50 = vmul.f32 0.5, %v676_v13  ;;  %v2229_v59 = vpack.c.bf16 %v1270_v62, %v1269_v60  ;;  %v1254_v10 = vld [vmem:[#allocation9 + $0x58] sm:$0xff]  ;;  %v1271_v12 = vld [vmem:[#allocation9 + $0xe0] sm:$0xff]  ;;  %v1272_v13 = vld [vmem:[#allocation9 + $0xe8] sm:$0xff] }
 0x20d   : > { %v2522_v19 = vpop.eup %2521  ;;  %v804_v21 = vadd.f32 1.0, %v2520_v17  ;;  %v747_v41 = vmul.f32 0.70710677, %v678_v15  ;;  %v681_v42 = vpop.f32.mrb[30].mxu0  ;;  %v715_v40 = vmul.f32 0.5, %v678_v15  ;;  %v2231_v11 = vpack.c.bf16 %v1254_v10, %v1253_v9  ;;  %v1256_v15 = vld [vmem:[#allocation9 + $0x68] sm:$0xff] }
 0x20e   : > { %v805_v23 = vadd.f32 1.0, %v2522_v19  ;;  %2531 = verf.f32 %v746_v7  ;;  %v682_v24 = vadd.f32 %v681_v42, %v3422_v5  ;;  %v683_v25 = vpop.f32.mrb[31].mxu0  ;;  %1046 = vmatprep.mubr.f32.mxu1 %v835_v18  ;;  %v710_v5 = vmul.f32 0.5, %v3523_v29  ;;  %2230 = vmatprep.subr.bf16.mxu0 %v2229_v59  ;;  %v1273_v7 = vld [vmem:[#allocation9 + $0xf0] sm:$0xff]  ;;  %v1274_v18 = vld [vmem:[#allocation9 + $0xf8] sm:$0xff] }
 0x20f   : > { %2533 = verf.f32 %v747_v41  ;;  %v684_v20 = vadd.f32 %v683_v25, %v3426_v6  ;;  %1047 = vmatmul.mubr.f32.gmra.mrb[20].mxu1 %v834_v63  ;;  %v836_v48 = vmul.f32 %v804_v21, %v708_v14  ;;  %2278 = vmatprep.subr.bf16.mxu1 %v2229_v59  ;;  %v2233_v58 = vpack.c.bf16 %v1272_v13, %v1271_v12  ;;  %v1257_v21 = vld [vmem:[#allocation9 + $0x70] sm:$0xff]  ;;  %v1258_v41 = vld [vmem:[#allocation9 + $0x78] sm:$0xff]  ;;  %v910_v63 = vld [vmem:[%s3993_s29] sm:$0x3] }
 0x210   : > { %v2524_v27 = vpop.eup %2523  ;;  %v748_v31 = vmul.f32 0.70710677, %v682_v24  ;;  %v837_v32 = vmul.f32 %v805_v23, %v709_v22  ;;  %v716_v43 = vmul.f32 0.5, %v682_v24  ;;  %2232 = vmatpush3.bf16.msra.mxu0 %v2231_v11  ;;  %2286 = vmatpush3.bf16.msra.mxu1 %v2231_v11  ;;  %v2235_v17 = vpack.c.bf16 %v1256_v15, %v1255_v57 }
 0x211   : > { %v2526_v33 = vpop.eup %2525  ;;  %v806_v34 = vadd.f32 1.0, %v2524_v27  ;;  %v749_v47 = vmul.f32 0.70710677, %v684_v20  ;;  %v717_v61 = vmul.f32 0.5, %v684_v20  ;;  %2234 = vmatprep.subr.bf16.mxu0 %v2233_v58  ;;  %2279 = vmatprep.subr.bf16.mxu1 %v2233_v58  ;;  %v2237_v19 = vpack.c.bf16 %v1274_v18, %v1273_v7 }
 0x212   : > { %v807_v28 = vadd.f32 1.0, %v2526_v33  ;;  %2535 = verf.f32 %v748_v31  ;;  %1052 = vmatprep.mubr.f32.mxu1 %v837_v32  ;;  %v2239_v42 = vpack.c.bf16 %v1258_v41, %v1257_v21  ;;  %v3554_v22 = vrot.slane %v910_v63, %v517_v2 }
 0x213   : > { %2537 = verf.f32 %v749_v47  ;;  %1053 = vmatmul.mubr.f32.gmra.mrb[22].mxu1 %v836_v48  ;;  %v838_v38 = vmul.f32 %v806_v34, %v710_v5  ;;  %v3558_v23 = vrot.slane %v910_v63, %v521_v4 }
 0x214   : > { %v2528_v16 = vpop.eup %2527  ;;  %v839_v36 = vmul.f32 %v807_v28, %v711_v30  ;;  %2236 = vmatpush3.bf16.msra.mxu0 %v2235_v17  ;;  %2287 = vmatpush3.bf16.msra.mxu1 %v2235_v17 }
 0x215   : > { %v2530_v6 = vpop.eup %2529  ;;  %v808_v37 = vadd.f32 1.0, %v2528_v16  ;;  %2238 = vmatprep.subr.bf16.mxu0 %v2237_v19  ;;  %2280 = vmatprep.subr.bf16.mxu1 %v2237_v19 }
 0x216   : > { %v809_v39 = vadd.f32 1.0, %v2530_v6  ;;  %1058 = vmatprep.mubr.f32.mxu1 %v839_v36 }
 0x217   : > { %1059 = vmatmul.mubr.f32.gmra.mrb[24].mxu1 %v838_v38  ;;  %v840_v53 = vmul.f32 %v808_v37, %v712_v45 }
 0x218   : > { %v2532_v46 = vpop.eup %2531  ;;  %v841_v44 = vmul.f32 %v809_v39, %v713_v26  ;;  %2240 = vmatpush3.bf16.msra.mxu0 %v2239_v42  ;;  %2288 = vmatpush3.bf16.msra.mxu1 %v2239_v42 }
 0x219   : > { %v2534_v49 = vpop.eup %2533  ;;  %v810_v54 = vadd.f32 1.0, %v2532_v46 }
 0x21a   : > { %v811_v29 = vadd.f32 1.0, %v2534_v49  ;;  %1064 = vmatprep.mubr.f32.mxu1 %v841_v44 }
 0x21b   : > { %1065 = vmatmul.mubr.f32.gmra.mrb[26].mxu1 %v840_v53  ;;  %v842_v56 = vmul.f32 %v810_v54, %v714_v50 }
 0x21c   : > { %v2536_v51 = vpop.eup %2535  ;;  %v843_v52 = vmul.f32 %v811_v29, %v715_v40 }
 0x21d   : > { %v2538_v55 = vpop.eup %2537  ;;  %v812_v35 = vadd.f32 1.0, %v2536_v51 }
 0x21e   : > { %v813_v0 = vadd.f32 1.0, %v2538_v55  ;;  %1070 = vmatprep.mubr.f32.mxu1 %v843_v52 }
 0x21f   : > { %1071 = vmatmul.mubr.f32.gmra.mrb[28].mxu1 %v842_v56  ;;  %v844_v8 = vmul.f32 %v812_v35, %v716_v43 }
 0x220   : > { %v845_v3 = vmul.f32 %v813_v0, %v717_v61 }
 0x222   : > { %1076 = vmatprep.mubr.f32.mxu1 %v845_v3 }
 0x223   : > { %1077 = vmatmul.mubr.f32.gmra.mrb[30].mxu1 %v844_v8 }
 0x2ba   : > { %v988_v24 = vpop.f32.mrb[0].mxu1 }
 0x2bb   : > { %v989_v25 = vadd.f32 %v988_v24, %v3554_v22  ;;  %v990_v14 = vpop.f32.mrb[1].mxu1 }
 0x2bc   : > { %v991_v20 = vadd.f32 %v990_v14, %v3558_v23 }
 0x2bd   : > { %v1115_v27 = vmul.f32 0.70710677, %v989_v25  ;;  %v1083_v50 = vmul.f32 0.5, %v989_v25 }
 0x2be   : > { %v1116_v31 = vmul.f32 0.70710677, %v991_v20  ;;  %v994_v32 = vpop.f32.mrb[2].mxu1  ;;  %v1084_v54 = vmul.f32 0.5, %v991_v20 }
 0x2bf   : > { %2539 = verf.f32 %v1115_v27  ;;  %v995_v33 = vadd.f32 %v994_v32, %v3554_v22  ;;  %v996_v34 = vpop.f32.mrb[3].mxu1 }
 0x2c0   : > { %2541 = verf.f32 %v1116_v31  ;;  %v997_v2 = vadd.f32 %v996_v34, %v3558_v23 }
 0x2c1   : > { %v1117_v47 = vmul.f32 0.70710677, %v995_v33  ;;  %v1085_v9 = vmul.f32 0.5, %v995_v33 }
 0x2c2   : > { %v1118_v1 = vmul.f32 0.70710677, %v997_v2  ;;  %v1000_v4 = vpop.f32.mrb[4].mxu1  ;;  %v1086_v8 = vmul.f32 0.5, %v997_v2 }
 0x2c3   : > { %2543 = verf.f32 %v1117_v47  ;;  %v1001_v48 = vadd.f32 %v1000_v4, %v3554_v22  ;;  %v1002_v30 = vpop.f32.mrb[5].mxu1 }
 0x2c4   : > { %2545 = verf.f32 %v1118_v1  ;;  %v1003_v28 = vadd.f32 %v1002_v30, %v3558_v23 }
 0x2c5   : > { %v1119_v5 = vmul.f32 0.70710677, %v1001_v48  ;;  %v1087_v42 = vmul.f32 0.5, %v1001_v48 }
 0x2c6   : > { %v1120_v16 = vmul.f32 0.70710677, %v1003_v28  ;;  %v1006_v36 = vpop.f32.mrb[6].mxu1  ;;  %v1088_v18 = vmul.f32 0.5, %v1003_v28 }
 0x2c7   : > { %2547 = verf.f32 %v1119_v5  ;;  %v3567_v6 = vadd.f32 %v1006_v36, %v3554_v22  ;;  %v1008_v37 = vpop.f32.mrb[7].mxu1 }
 0x2c8   : > { %2549 = verf.f32 %v1120_v16  ;;  %v1009_v38 = vadd.f32 %v1008_v37, %v3558_v23 }
 0x2c9   : > { %v2540_v26 = vpop.eup %2539  ;;  %v1121_v39 = vmul.f32 0.70710677, %v3567_v6  ;;  %v1089_v4 = vmul.f32 0.5, %v3567_v6 }
 0x2ca   : > { %v2542_v45 = vpop.eup %2541  ;;  %v1179_v46 = vadd.f32 1.0, %v2540_v26  ;;  %v1122_v44 = vmul.f32 0.70710677, %v1009_v38  ;;  %v1012_v49 = vpop.f32.mrb[8].mxu1  ;;  %v1090_v34 = vmul.f32 0.5, %v1009_v38 }
 0x2cb   : > { %v1180_v53 = vadd.f32 1.0, %v2542_v45  ;;  %2551 = verf.f32 %v1121_v39  ;;  %v3572_v40 = vadd.f32 %v1012_v49, %v3554_v22  ;;  %v1014_v29 = vpop.f32.mrb[9].mxu1 }
 0x2cc   : > { %2553 = verf.f32 %v1122_v44  ;;  %v3575_v51 = vadd.f32 %v1014_v29, %v3558_v23  ;;  %v1211_v61 = vmul.f32 %v1179_v46, %v1083_v50 }
 0x2cd   : > { %v2544_v52 = vpop.eup %2543  ;;  %v1123_v55 = vmul.f32 0.70710677, %v3572_v40  ;;  %v1212_v35 = vmul.f32 %v1180_v53, %v1084_v54  ;;  %v1091_v44 = vmul.f32 0.5, %v3572_v40 }
 0x2ce   : > { %v2546_v56 = vpop.eup %2545  ;;  %v1181_v0 = vadd.f32 1.0, %v2544_v52  ;;  %v1124_v43 = vmul.f32 0.70710677, %v3575_v51  ;;  %v1018_v3 = vpop.f32.mrb[10].mxu1  ;;  %v1092_v39 = vmul.f32 0.5, %v3575_v51 }
 0x2cf   : > { %v1182_v60 = vadd.f32 1.0, %v2546_v56  ;;  %2555 = verf.f32 %v1123_v55  ;;  %v3580_v62 = vadd.f32 %v1018_v3, %v3554_v22  ;;  %v1020_v59 = vpop.f32.mrb[11].mxu1  ;;  %1346 = vmatprep.mubr.f32.mxu0 %v1212_v35 }
 0x2d0   : > { %2557 = verf.f32 %v1124_v43  ;;  %v3583_v10 = vadd.f32 %v1020_v59, %v3558_v23  ;;  %1347 = vmatmul.mubr.f32.vlgmr.msra.gmra.mrb[32].mxu0 %v1211_v61  ;;  %v1213_v7 = vmul.f32 %v1181_v0, %v1085_v9 }
 0x2d1   : > { %v2548_v11 = vpop.eup %2547  ;;  %v1125_v12 = vmul.f32 0.70710677, %v3580_v62  ;;  %v1214_v13 = vmul.f32 %v1182_v60, %v1086_v8  ;;  %v1093_v43 = vmul.f32 0.5, %v3580_v62 }
 0x2d2   : > { %v2550_v58 = vpop.eup %2549  ;;  %v1183_v57 = vadd.f32 1.0, %v2548_v11  ;;  %v1126_v15 = vmul.f32 0.70710677, %v3583_v10  ;;  %v1024_v17 = vpop.f32.mrb[12].mxu1  ;;  %v1094_v56 = vmul.f32 0.5, %v3583_v10 }
 0x2d3   : > { %v1184_v19 = vadd.f32 1.0, %v2550_v58  ;;  %2559 = verf.f32 %v1125_v12  ;;  %v3588_v21 = vadd.f32 %v1024_v17, %v3554_v22  ;;  %v1026_v41 = vpop.f32.mrb[13].mxu1  ;;  %1351 = vmatprep.mubr.f32.mxu0 %v1214_v13 }
 0x2d4   : > { %2561 = verf.f32 %v1126_v15  ;;  %v3591_v63 = vadd.f32 %v1026_v41, %v3558_v23  ;;  %1352 = vmatmul.mubr.f32.gmra.mrb[34].mxu0 %v1213_v7  ;;  %v1215_v33 = vmul.f32 %v1183_v57, %v1087_v42 }
 0x2d5   : > { %v2552_v24 = vpop.eup %2551  ;;  %v1127_v25 = vmul.f32 0.70710677, %v3588_v21  ;;  %v1216_v14 = vmul.f32 %v1184_v19, %v1088_v18  ;;  %v1095_v17 = vmul.f32 0.5, %v3588_v21 }
 0x2d6   : > { %v2554_v20 = vpop.eup %2553  ;;  %v1185_v27 = vadd.f32 1.0, %v2552_v24  ;;  %v1128_v31 = vmul.f32 0.70710677, %v3591_v63  ;;  %v1030_v32 = vpop.f32.mrb[14].mxu1  ;;  %v1096_v58 = vmul.f32 0.5, %v3591_v63 }
 0x2d7   : > { %v1186_v2 = vadd.f32 1.0, %v2554_v20  ;;  %2563 = verf.f32 %v1127_v25  ;;  %v3596_v47 = vadd.f32 %v1030_v32, %v3554_v22  ;;  %v1032_v1 = vpop.f32.mrb[15].mxu1  ;;  %1356 = vmatprep.mubr.f32.mxu0 %v1216_v14 }
 0x2d8   : > { %2565 = verf.f32 %v1128_v31  ;;  %v3600_v48 = vadd.f32 %v1032_v1, %v3558_v23  ;;  %1357 = vmatmul.mubr.f32.gmra.mrb[36].mxu0 %v1215_v33  ;;  %v1217_v26 = vmul.f32 %v1185_v27, %v1089_v4 }
 0x2d9   : > { %v2556_v30 = vpop.eup %2555  ;;  %v1129_v28 = vmul.f32 0.70710677, %v3596_v47  ;;  %v1218_v5 = vmul.f32 %v1186_v2, %v1090_v34  ;;  %v1097_v32 = vmul.f32 0.5, %v3596_v47 }
 0x2da   : > { %v2558_v16 = vpop.eup %2557  ;;  %v1187_v36 = vadd.f32 1.0, %v2556_v30  ;;  %v1130_v37 = vmul.f32 0.70710677, %v3600_v48  ;;  %v1036_v38 = vpop.f32.mrb[16].mxu1  ;;  %v1098_v20 = vmul.f32 0.5, %v3600_v48 }
 0x2db   : > { %v1188_v45 = vadd.f32 1.0, %v2558_v16  ;;  %2567 = verf.f32 %v1129_v28  ;;  %v3606_v6 = vadd.f32 %v1036_v38, %v3554_v22  ;;  %v1038_v46 = vpop.f32.mrb[17].mxu1  ;;  %1361 = vmatprep.mubr.f32.mxu0 %v1218_v5 }
 0x2dc   : > { %2569 = verf.f32 %v1130_v37  ;;  %v3610_v49 = vadd.f32 %v1038_v46, %v3558_v23  ;;  %1362 = vmatmul.mubr.f32.gmra.mrb[38].mxu0 %v1217_v26  ;;  %v1219_v35 = vmul.f32 %v1187_v36, %v1091_v44 }
 0x2dd   : > { %v2560_v54 = vpop.eup %2559  ;;  %v1131_v53 = vmul.f32 0.70710677, %v3606_v6  ;;  %v1220_v29 = vmul.f32 %v1188_v45, %v1092_v39  ;;  %v1099_v38 = vmul.f32 0.5, %v3606_v6 }
 0x2de   : > { %v2562_v50 = vpop.eup %2561  ;;  %v1189_v51 = vadd.f32 1.0, %v2560_v54  ;;  %v1132_v52 = vmul.f32 0.70710677, %v3610_v49  ;;  %v1042_v55 = vpop.f32.mrb[18].mxu1  ;;  %v1100_v16 = vmul.f32 0.5, %v3610_v49 }
 0x2df   : > { %v1190_v61 = vadd.f32 1.0, %v2562_v50  ;;  %2571 = verf.f32 %v1131_v53  ;;  %v3616_v40 = vadd.f32 %v1042_v55, %v3554_v22  ;;  %v1044_v0 = vpop.f32.mrb[19].mxu1  ;;  %1366 = vmatprep.mubr.f32.mxu0 %v1220_v29 }
 0x2e0   : > { %2573 = verf.f32 %v1132_v52  ;;  %v3620_v3 = vadd.f32 %v1044_v0, %v3558_v23  ;;  %1367 = vmatmul.mubr.f32.gmra.mrb[40].mxu0 %v1219_v35  ;;  %v1221_v13 = vmul.f32 %v1189_v51, %v1093_v43 }
 0x2e1   : > { %v2564_v8 = vpop.eup %2563  ;;  %v1133_v60 = vmul.f32 0.70710677, %v3616_v40  ;;  %v1222_v59 = vmul.f32 %v1190_v61, %v1094_v56  ;;  %v1101_v55 = vmul.f32 0.5, %v3616_v40 }
 0x2e2   : > { %v2566_v9 = vpop.eup %2565  ;;  %v1191_v10 = vadd.f32 1.0, %v2564_v8  ;;  %v1134_v11 = vmul.f32 0.70710677, %v3620_v3  ;;  %v1048_v12 = vpop.f32.mrb[20].mxu1  ;;  %v1102_v50 = vmul.f32 0.5, %v3620_v3 }
 0x2e3   : > { %v1192_v57 = vadd.f32 1.0, %v2566_v9  ;;  %2575 = verf.f32 %v1133_v60  ;;  %v3626_v62 = vadd.f32 %v1048_v12, %v3554_v22  ;;  %v1050_v15 = vpop.f32.mrb[21].mxu1  ;;  %1371 = vmatprep.mubr.f32.mxu0 %v1222_v59 }
 0x2e4   : > { %2577 = verf.f32 %v1134_v11  ;;  %v3630_v7 = vadd.f32 %v1050_v15, %v3558_v23  ;;  %1372 = vmatmul.mubr.f32.gmra.mrb[42].mxu0 %v1221_v13  ;;  %v1223_v14 = vmul.f32 %v1191_v10, %v1095_v17 }
 0x2e5   : > { %v2568_v18 = vpop.eup %2567  ;;  %v1135_v19 = vmul.f32 0.70710677, %v3626_v62  ;;  %v1224_v41 = vmul.f32 %v1192_v57, %v1096_v58  ;;  %v1103_v12 = vmul.f32 0.5, %v3626_v62 }
 0x2e6   : > { %v2570_v42 = vpop.eup %2569  ;;  %v1193_v63 = vadd.f32 1.0, %v2568_v18  ;;  %v1136_v24 = vmul.f32 0.70710677, %v3630_v7  ;;  %v1054_v25 = vpop.f32.mrb[22].mxu1  ;;  %v1104_v9 = vmul.f32 0.5, %v3630_v7 }
 0x2e7   : > { %v1194_v27 = vadd.f32 1.0, %v2570_v42  ;;  %2579 = verf.f32 %v1135_v19  ;;  %v3636_v21 = vadd.f32 %v1054_v25, %v3554_v22  ;;  %v1056_v31 = vpop.f32.mrb[23].mxu1  ;;  %1376 = vmatprep.mubr.f32.mxu0 %v1224_v41 }
 0x2e8   : > { %2581 = verf.f32 %v1136_v24  ;;  %v3640_v33 = vadd.f32 %v1056_v31, %v3558_v23  ;;  %1377 = vmatmul.mubr.f32.gmra.mrb[44].mxu0 %v1223_v14  ;;  %v1225_v5 = vmul.f32 %v1193_v63, %v1097_v32 }
 0x2e9   : > { %v2572_v34 = vpop.eup %2571  ;;  %v1137_v2 = vmul.f32 0.70710677, %v3636_v21  ;;  %v1226_v1 = vmul.f32 %v1194_v27, %v1098_v20  ;;  %v1105_v62 = vmul.f32 0.5, %v3636_v21 }
 0x2ea   : > { %v2574_v4 = vpop.eup %2573  ;;  %v1195_v48 = vadd.f32 1.0, %v2572_v34  ;;  %v1138_v30 = vmul.f32 0.70710677, %v3640_v33  ;;  %v1060_v28 = vpop.f32.mrb[24].mxu1  ;;  %v1106_v42 = vmul.f32 0.5, %v3640_v33 }
 0x2eb   : > { %v1196_v36 = vadd.f32 1.0, %v2574_v4  ;;  %2583 = verf.f32 %v1137_v2  ;;  %v3646_v47 = vadd.f32 %v1060_v28, %v3554_v22  ;;  %v1062_v37 = vpop.f32.mrb[25].mxu1  ;;  %1381 = vmatprep.mubr.f32.mxu0 %v1226_v1 }
 0x2ec   : > { %2585 = verf.f32 %v1138_v30  ;;  %v3650_v26 = vadd.f32 %v1062_v37, %v3558_v23  ;;  %1382 = vmatmul.mubr.f32.gmra.mrb[46].mxu0 %v1225_v5  ;;  %v1227_v29 = vmul.f32 %v1195_v48, %v1099_v38 }
 0x2ed   : > { %v2576_v39 = vpop.eup %2575  ;;  %v1139_v45 = vmul.f32 0.70710677, %v3646_v47  ;;  %v1228_v46 = vmul.f32 %v1196_v36, %v1100_v16 }
 0x2ee   : > { %v2578_v44 = vpop.eup %2577  ;;  %v1197_v49 = vadd.f32 1.0, %v2576_v39  ;;  %v1140_v54 = vmul.f32 0.70710677, %v3650_v26  ;;  %v1066_v53 = vpop.f32.mrb[26].mxu1  ;;  %v1108_v33 = vmul.f32 0.5, %v3650_v26 }
 0x2ef   : > { %v1198_v51 = vadd.f32 1.0, %v2578_v44  ;;  %2587 = verf.f32 %v1139_v45  ;;  %v3656_v6 = vadd.f32 %v1066_v53, %v3554_v22  ;;  %v1068_v52 = vpop.f32.mrb[27].mxu1  ;;  %1386 = vmatprep.mubr.f32.mxu0 %v1228_v46 }
 0x2f0   : > { %2589 = verf.f32 %v1140_v54  ;;  %v1069_v35 = vadd.f32 %v1068_v52, %v3558_v23  ;;  %1387 = vmatmul.mubr.f32.gmra.mrb[48].mxu0 %v1227_v29  ;;  %v1229_v59 = vmul.f32 %v1197_v49, %v1101_v55 }
 0x2f1   : > { %v2580_v56 = vpop.eup %2579  ;;  %v1141_v61 = vmul.f32 0.70710677, %v3656_v6  ;;  %v1230_v0 = vmul.f32 %v1198_v51, %v1102_v50  ;;  %v1109_v36 = vmul.f32 0.5, %v3656_v6 }
 0x2f2   : > { %v2582_v43 = vpop.eup %2581  ;;  %v1199_v8 = vadd.f32 1.0, %v2580_v56  ;;  %v1142_v3 = vmul.f32 0.70710677, %v1069_v35  ;;  %v1072_v60 = vpop.f32.mrb[28].mxu1  ;;  %v1110_v5 = vmul.f32 0.5, %v1069_v35 }
 0x2f3   : > { %v1200_v10 = vadd.f32 1.0, %v2582_v43  ;;  %2591 = verf.f32 %v1141_v61  ;;  %v1073_v11 = vadd.f32 %v1072_v60, %v3554_v22  ;;  %v1074_v40 = vpop.f32.mrb[29].mxu1  ;;  %1391 = vmatprep.mubr.f32.mxu0 %v1230_v0  ;;  %v3675_v0 = vld [vmem:[%s3994_s6] ss:$0 sm:$0xff] }
 0x2f4   : > { %2593 = verf.f32 %v1142_v3  ;;  %v1075_v13 = vadd.f32 %v1074_v40, %v3558_v23  ;;  %1392 = vmatmul.mubr.f32.gmra.mrb[50].mxu0 %v1229_v59  ;;  %v1231_v7 = vmul.f32 %v1199_v8, %v1103_v12 }
 0x2f5   : > { %v2584_v58 = vpop.eup %2583  ;;  %v1143_v57 = vmul.f32 0.70710677, %v1073_v11  ;;  %v1232_v15 = vmul.f32 %v1200_v10, %v1104_v9  ;;  %v1111_v44 = vmul.f32 0.5, %v1073_v11 }
 0x2f6   : > { %v2586_v17 = vpop.eup %2585  ;;  %v1201_v18 = vadd.f32 1.0, %v2584_v58  ;;  %v1144_v19 = vmul.f32 0.70710677, %v1075_v13  ;;  %v1078_v41 = vpop.f32.mrb[30].mxu1  ;;  %v1112_v46 = vmul.f32 0.5, %v1075_v13 }
 0x2f7   : > { %v1202_v63 = vadd.f32 1.0, %v2586_v17  ;;  %2595 = verf.f32 %v1143_v57  ;;  %v1079_v24 = vadd.f32 %v1078_v41, %v3554_v22  ;;  %v1080_v25 = vpop.f32.mrb[31].mxu1  ;;  %1396 = vmatprep.mubr.f32.mxu0 %v1232_v15  ;;  %v1107_v22 = vmul.f32 0.5, %v3646_v47 }
 0x2f8   : > { %2597 = verf.f32 %v1144_v19  ;;  %v1081_v14 = vadd.f32 %v1080_v25, %v3558_v23  ;;  %1397 = vmatmul.mubr.f32.gmra.mrb[52].mxu0 %v1231_v7  ;;  %v1233_v1 = vmul.f32 %v1201_v18, %v1105_v62 }
 0x2f9   : > { %v2588_v20 = vpop.eup %2587  ;;  %v1145_v27 = vmul.f32 0.70710677, %v1079_v24  ;;  %v1234_v31 = vmul.f32 %v1202_v63, %v1106_v42  ;;  %v1113_v6 = vmul.f32 0.5, %v1079_v24 }
 0x2fa   : > { %v2590_v32 = vpop.eup %2589  ;;  %v1203_v34 = vadd.f32 1.0, %v2588_v20  ;;  %v1146_v2 = vmul.f32 0.70710677, %v1081_v14  ;;  %v1114_v51 = vmul.f32 0.5, %v1081_v14 }
 0x2fb   : > { %v1204_v4 = vadd.f32 1.0, %v2590_v32  ;;  %2599 = verf.f32 %v1145_v27  ;;  %1401 = vmatprep.mubr.f32.mxu0 %v1234_v31 }
 0x2fc   : > { %2601 = verf.f32 %v1146_v2  ;;  %1402 = vmatmul.mubr.f32.gmra.mrb[54].mxu0 %v1233_v1  ;;  %v1235_v30 = vmul.f32 %v1203_v34, %v1107_v22 }
 0x2fd   : > { %v2592_v21 = vpop.eup %2591  ;;  %v1236_v48 = vmul.f32 %v1204_v4, %v1108_v33 }
 0x2fe   : > { %v2594_v23 = vpop.eup %2593  ;;  %v1205_v28 = vadd.f32 1.0, %v2592_v21 }
 0x2ff   : > { %v1206_v16 = vadd.f32 1.0, %v2594_v23  ;;  %1406 = vmatprep.mubr.f32.mxu1 %v1236_v48 }
 0x300   : > { %1407 = vmatmul.mubr.f32.vlgmr.msra.gmra.mrb[32].mxu1 %v1235_v30  ;;  %v1237_v45 = vmul.f32 %v1205_v28, %v1109_v36 }
 0x301   : > { %v2596_v37 = vpop.eup %2595  ;;  %v1238_v38 = vmul.f32 %v1206_v16, %v1110_v5 }
 0x302   : > { %v2598_v26 = vpop.eup %2597  ;;  %v1207_v39 = vadd.f32 1.0, %v2596_v37 }
 0x303   : > { %v1208_v47 = vadd.f32 1.0, %v2598_v26  ;;  %1411 = vmatprep.mubr.f32.mxu1 %v1238_v38 }
 0x304   : > { %1412 = vmatmul.mubr.f32.gmra.mrb[34].mxu1 %v1237_v45  ;;  %v1239_v50 = vmul.f32 %v1207_v39, %v1111_v44 }
 0x305   : > { %v2600_v49 = vpop.eup %2599  ;;  %v1240_v54 = vmul.f32 %v1208_v47, %v1112_v46 }
 0x306   : > { %v2602_v53 = vpop.eup %2601  ;;  %v1209_v29 = vadd.f32 1.0, %v2600_v49 }
 0x307   : > { %v1210_v52 = vadd.f32 1.0, %v2602_v53  ;;  %1416 = vmatprep.mubr.f32.mxu1 %v1240_v54 }
 0x308   : > { %1417 = vmatmul.mubr.f32.gmra.mrb[36].mxu1 %v1239_v50  ;;  %v1241_v35 = vmul.f32 %v1209_v29, %v1113_v6 }
 0x309   : > { %v1242_v55 = vmul.f32 %v1210_v52, %v1114_v51 }
 0x30b   : > { %1421 = vmatprep.mubr.f32.mxu1 %v1242_v55 }
 0x30c   : > { %1422 = vmatmul.mubr.f32.gmra.mrb[38].mxu1 %v1241_v35 }
 0x3a3   : > { %v1977_v56 = vpop.f32.mrb[32].mxu0 }
 0x3a4   : > { %v1978_v61 = vpop.f32.mrb[33].mxu0 }
 0x3a5   : > { %v1979_v43 = vadd.f32 %v1978_v61, %v1977_v56 }
 0x3a7   : > { %v1980_v8 = vpop.f32.mrb[34].mxu0  ;;  %v3678_v3 = vadd.f32 %v1979_v43, %v3675_v0 }
 0x3a8   : > { %v1981_v60 = vpop.f32.mrb[35].mxu0 }
 0x3a9   : > { %v1982_v59 = vadd.f32 %v1981_v60, %v1980_v8  ;;  %v1427_v9 = vmul.f32 %v3678_v3, %v3678_v3 }
 0x3ab   : > { %v3683_v10 = vadd.f32 %v1982_v59, %v3675_v0  ;;  %v1983_v11 = vpop.f32.mrb[36].mxu0  ;;  %1443 = vadd.xlane.f32.xlu0 %v1427_v9 }
 0x3ac   : > { %v1984_v40 = vpop.f32.mrb[37].mxu0 }
 0x3ad   : > { %v1985_v12 = vadd.f32 %v1984_v40, %v1983_v11  ;;  %v1428_v13 = vmul.f32 %v3683_v10, %v3683_v10 }
 0x3af   : > { %v1986_v58 = vpop.f32.mrb[38].mxu0  ;;  %1445 = vadd.xlane.f32.xlu0 %v1428_v13  ;;  %v3688_v57 = vadd.f32 %v1985_v12, %v3675_v0 }
 0x3b0   : > { %v1987_v15 = vpop.f32.mrb[39].mxu0 }
 0x3b1   : > { %v1988_v17 = vadd.f32 %v1987_v15, %v1986_v58  ;;  %v1429_v18 = vmul.f32 %v3688_v57, %v3688_v57 }
 0x3b3   : > { %v3693_v19 = vadd.f32 %v1988_v17, %v3675_v0  ;;  %v1989_v41 = vpop.f32.mrb[40].mxu0  ;;  %1447 = vadd.xlane.f32.xlu1 %v1429_v18 }
 0x3b4   : > { %v1990_v7 = vpop.f32.mrb[41].mxu0 }
 0x3b5   : > { %v1991_v42 = vadd.f32 %v1990_v7, %v1989_v41  ;;  %v1430_v63 = vmul.f32 %v3693_v19, %v3693_v19 }
 0x3b7   : > { %v3698_v24 = vadd.f32 %v1991_v42, %v3675_v0  ;;  %v1992_v25 = vpop.f32.mrb[42].mxu0  ;;  %1449 = vadd.xlane.f32.xlu1 %v1430_v63 }
 0x3b8   : > { %v1993_v62 = vpop.f32.mrb[43].mxu0 }
 0x3b9   : > { %v1994_v14 = vadd.f32 %v1993_v62, %v1992_v25  ;;  %v1431_v20 = vmul.f32 %v3698_v24, %v3698_v24 }
 0x3bb   : > { %v3703_v27 = vadd.f32 %v1994_v14, %v3675_v0  ;;  %v1995_v31 = vpop.f32.mrb[44].mxu0  ;;  %1451 = vadd.xlane.f32.xlu0 %v1431_v20 }
 0x3bc   : > { %v1996_v32 = vpop.f32.mrb[45].mxu0 }
 0x3bd   : > { %v1997_v34 = vadd.f32 %v1996_v32, %v1995_v31  ;;  %v1432_v2 = vmul.f32 %v3703_v27, %v3703_v27 }
 0x3bf   : > { %v3708_v1 = vadd.f32 %v1997_v34, %v3675_v0  ;;  %v1998_v33 = vpop.f32.mrb[46].mxu0  ;;  %1453 = vadd.xlane.f32.xlu1 %v1432_v2 }
 0x3c0   : > { %v1999_v4 = vpop.f32.mrb[47].mxu0 }
 0x3c1   : > { %v2000_v22 = vadd.f32 %v1999_v4, %v1998_v33  ;;  %v1433_v21 = vmul.f32 %v3708_v1, %v3708_v1 }
 0x3c3   : > { %v3713_v48 = vadd.f32 %v2000_v22, %v3675_v0  ;;  %v2001_v23 = vpop.f32.mrb[48].mxu0  ;;  %1455 = vadd.xlane.f32.xlu0 %v1433_v21 }
 0x3c4   : > { %v2002_v30 = vpop.f32.mrb[49].mxu0 }
 0x3c5   : > { %v2003_v28 = vadd.f32 %v2002_v30, %v2001_v23  ;;  %v1434_v5 = vmul.f32 %v3713_v48, %v3713_v48 }
 0x3c7   : > { %v3718_v16 = vadd.f32 %v2003_v28, %v3675_v0  ;;  %v2004_v36 = vpop.f32.mrb[50].mxu0  ;;  %1457 = vadd.xlane.f32.xlu1 %v1434_v5 }
 0x3c8   : > { %v2005_v37 = vpop.f32.mrb[51].mxu0 }
 0x3c9   : > { %v2006_v38 = vadd.f32 %v2005_v37, %v2004_v36  ;;  %v1435_v26 = vmul.f32 %v3718_v16, %v3718_v16 }
 0x3cb   : > { %v3723_v39 = vadd.f32 %v2006_v38, %v3675_v0  ;;  %v2007_v45 = vpop.f32.mrb[52].mxu0  ;;  %1459 = vadd.xlane.f32.xlu0 %v1435_v26 }
 0x3cc   : > { %v2008_v46 = vpop.f32.mrb[53].mxu0 }
 0x3cd   : > { %v2009_v47 = vadd.f32 %v2008_v46, %v2007_v45  ;;  %v1436_v44 = vmul.f32 %v3723_v39, %v3723_v39 }
 0x3cf   : > { %v3728_v49 = vadd.f32 %v2009_v47, %v3675_v0  ;;  %v2010_v54 = vpop.f32.mrb[54].mxu0  ;;  %1461 = vadd.xlane.f32.xlu1 %v1436_v44 }
 0x3d0   : > { %v2011_v53 = vpop.f32.mrb[55].mxu0 }
 0x3d1   : > { %v2012_v29 = vadd.f32 %v2011_v53, %v2010_v54  ;;  %v1437_v50 = vmul.f32 %v3728_v49, %v3728_v49 }
 0x3d3   : > { %v3733_v51 = vadd.f32 %v2012_v29, %v3675_v0  ;;  %v2013_v52 = vpop.f32.mrb[32].mxu1  ;;  %1463 = vadd.xlane.f32.xlu0 %v1437_v50 }
 0x3d4   : > { %v2014_v6 = vpop.f32.mrb[33].mxu1 }
 0x3d5   : > { %v2015_v55 = vadd.f32 %v2014_v6, %v2013_v52  ;;  %v1438_v35 = vmul.f32 %v3733_v51, %v3733_v51 }
 0x3d7   : > { %v3738_v56 = vadd.f32 %v2015_v55, %v3675_v0  ;;  %v2016_v61 = vpop.f32.mrb[34].mxu1  ;;  %1465 = vadd.xlane.f32.xlu1 %v1438_v35 }
 0x3d8   : > { %v2017_v43 = vpop.f32.mrb[35].mxu1 }
 0x3d9   : > { %v2018_v8 = vadd.f32 %v2017_v43, %v2016_v61  ;;  %v1439_v60 = vmul.f32 %v3738_v56, %v3738_v56 }
 0x3db   : > { %v3743_v59 = vadd.f32 %v2018_v8, %v3675_v0  ;;  %v2019_v9 = vpop.f32.mrb[36].mxu1  ;;  %1467 = vadd.xlane.f32.xlu0 %v1439_v60 }
 0x3dc   : > { %v2020_v11 = vpop.f32.mrb[37].mxu1 }
 0x3dd   : > { %v2021_v40 = vadd.f32 %v2020_v11, %v2019_v9  ;;  %v1440_v12 = vmul.f32 %v3743_v59, %v3743_v59 }
 0x3df   : > { %v3748_v13 = vadd.f32 %v2021_v40, %v3675_v0  ;;  %v2022_v58 = vpop.f32.mrb[38].mxu1  ;;  %1469 = vadd.xlane.f32.xlu1 %v1440_v12 }
 0x3e0   : > { %v2023_v15 = vpop.f32.mrb[39].mxu1 }
 0x3e1   : > { %v2024_v17 = vadd.f32 %v2023_v15, %v2022_v58  ;;  %v1441_v18 = vmul.f32 %v3748_v13, %v3748_v13 }
 0x3e3   : > { %v3753_v41 = vadd.f32 %v2024_v17, %v3675_v0  ;;  %1471 = vadd.xlane.f32.xlu0 %v1441_v18 }
 0x3e5   : > { %v1442_v7 = vmul.f32 %v3753_v41, %v3753_v41 }
 0x3e7   : > { %1473 = vadd.xlane.f32.xlu1 %v1442_v7 }
 0x438   : > { %v1444_v42 = vpop.xlane.xlu0 %1443 }
 0x439   : > { %v1475_v63 = vmax.f32 %v1444_v42, 1e-24 }
 0x43b   : > { %2603 = vrsqrt.f32 %v1475_v63 }
 0x43c   : > { %v1446_v25 = vpop.xlane.xlu0 %1445 }
 0x43d   : > { %v1476_v62 = vmax.f32 %v1446_v25, 1e-24 }
 0x43f   : > { %2605 = vrsqrt.f32 %v1476_v62 }
 0x440   : > { %v1448_v14 = vpop.xlane.xlu1 %1447 }
 0x441   : > { %v1477_v20 = vmax.f32 %v1448_v14, 1e-24 }
 0x443   : > { %2607 = vrsqrt.f32 %v1477_v20 }
 0x444   : > { %v1450_v31 = vpop.xlane.xlu1 %1449 }
 0x445   : > { %v2604_v32 = vpop.eup %2603  ;;  %v1478_v34 = vmax.f32 %v1450_v31, 1e-24 }
 0x446   : > { %v1507_v0 = vmul.f32 %v2604_v32, %v3678_v3 }
 0x447   : > { %2609 = vrsqrt.f32 %v1478_v34 }
 0x448   : > { %1523 = vst [vmem:[#allocation2] sm:$0xff] %v1507_v0  ;;  %v1452_v2 = vpop.xlane.xlu0 %1451 }
 0x449   : > { %v2606_v33 = vpop.eup %2605  ;;  %v1479_v4 = vmax.f32 %v1452_v2, 1e-24 }
 0x44a   : > { %v1508_v22 = vmul.f32 %v2606_v33, %v3683_v10 }
 0x44b   : > { %2611 = vrsqrt.f32 %v1479_v4 }
 0x44c   : > { %1524 = vst [vmem:[#allocation2 + $0x8] sm:$0xff] %v1508_v22  ;;  %v1454_v21 = vpop.xlane.xlu1 %1453 }
 0x44d   : > { %v2608_v23 = vpop.eup %2607  ;;  %v1480_v30 = vmax.f32 %v1454_v21, 1e-24 }
 0x44e   : > { %v1509_v28 = vmul.f32 %v2608_v23, %v3688_v57 }
 0x44f   : > { %2613 = vrsqrt.f32 %v1480_v30 }
 0x450   : > { %1525 = vst [vmem:[#allocation2 + $0x10] sm:$0xff] %v1509_v28  ;;  %v1456_v5 = vpop.xlane.xlu0 %1455 }
 0x451   : > { %v2610_v36 = vpop.eup %2609  ;;  %v1481_v37 = vmax.f32 %v1456_v5, 1e-24 }
 0x452   : > { %v1510_v3 = vmul.f32 %v2610_v36, %v3693_v19 }
 0x453   : > { %2615 = vrsqrt.f32 %v1481_v37 }
 0x454   : > { %1526 = vst [vmem:[#allocation2 + $0x18] sm:$0xff] %v1510_v3  ;;  %v1458_v38 = vpop.xlane.xlu1 %1457 }
 0x455   : > { %v2612_v26 = vpop.eup %2611  ;;  %v1482_v45 = vmax.f32 %v1458_v38, 1e-24 }
 0x456   : > { %v1511_v10 = vmul.f32 %v2612_v26, %v3698_v24 }
 0x457   : > { %2617 = vrsqrt.f32 %v1482_v45 }
 0x458   : > { %1527 = vst [vmem:[#allocation2 + $0x20] sm:$0xff] %v1511_v10  ;;  %v1460_v46 = vpop.xlane.xlu0 %1459 }
 0x459   : > { %v2614_v47 = vpop.eup %2613  ;;  %v1483_v44 = vmax.f32 %v1460_v46, 1e-24 }
 0x45a   : > { %v1512_v57 = vmul.f32 %v2614_v47, %v3703_v27 }
 0x45b   : > { %2619 = vrsqrt.f32 %v1483_v44 }
 0x45c   : > { %1528 = vst [vmem:[#allocation2 + $0x28] sm:$0xff] %v1512_v57  ;;  %v1462_v54 = vpop.xlane.xlu1 %1461 }
 0x45d   : > { %v2616_v53 = vpop.eup %2615  ;;  %v1484_v29 = vmax.f32 %v1462_v54, 1e-24 }
 0x45e   : > { %v1513_v19 = vmul.f32 %v2616_v53, %v3708_v1 }
 0x45f   : > { %2621 = vrsqrt.f32 %v1484_v29 }
 0x460   : > { %1529 = vst [vmem:[#allocation2 + $0x30] sm:$0xff] %v1513_v19  ;;  %v1464_v50 = vpop.xlane.xlu0 %1463 }
 0x461   : > { %v2618_v52 = vpop.eup %2617  ;;  %v1485_v6 = vmax.f32 %v1464_v50, 1e-24 }
 0x462   : > { %v1514_v24 = vmul.f32 %v2618_v52, %v3713_v48 }
 0x463   : > { %2623 = vrsqrt.f32 %v1485_v6 }
 0x464   : > { %1530 = vst [vmem:[#allocation2 + $0x38] sm:$0xff] %v1514_v24  ;;  %v1466_v55 = vpop.xlane.xlu1 %1465 }
 0x465   : > { %v2620_v35 = vpop.eup %2619  ;;  %v1486_v61 = vmax.f32 %v1466_v55, 1e-24 }
 0x466   : > { %v1515_v27 = vmul.f32 %v2620_v35, %v3718_v16 }
 0x467   : > { %2625 = vrsqrt.f32 %v1486_v61 }
 0x468   : > { %1531 = vst [vmem:[#allocation2 + $0x40] sm:$0xff] %v1515_v27  ;;  %v1468_v43 = vpop.xlane.xlu0 %1467 }
 0x469   : > { %v2622_v8 = vpop.eup %2621  ;;  %v1487_v60 = vmax.f32 %v1468_v43, 1e-24 }
 0x46a   : > { %v1516_v1 = vmul.f32 %v2622_v8, %v3723_v39 }
 0x46b   : > { %2627 = vrsqrt.f32 %v1487_v60 }
 0x46c   : > { %1532 = vst [vmem:[#allocation2 + $0x48] sm:$0xff] %v1516_v1  ;;  %v1470_v9 = vpop.xlane.xlu1 %1469 }
 0x46d   : > { %v2624_v11 = vpop.eup %2623  ;;  %v1488_v40 = vmax.f32 %v1470_v9, 1e-24 }
 0x46e   : > { %v1517_v48 = vmul.f32 %v2624_v11, %v3728_v49 }
 0x46f   : > { %2629 = vrsqrt.f32 %v1488_v40 }
 0x470   : > { %1533 = vst [vmem:[#allocation2 + $0x50] sm:$0xff] %v1517_v48  ;;  %v1472_v12 = vpop.xlane.xlu0 %1471 }
 0x471   : > { %v2626_v58 = vpop.eup %2625  ;;  %v1489_v15 = vmax.f32 %v1472_v12, 1e-24 }
 0x472   : > { %v1518_v16 = vmul.f32 %v2626_v58, %v3733_v51 }
 0x473   : > { %2631 = vrsqrt.f32 %v1489_v15 }
 0x474   : > { %1534 = vst [vmem:[#allocation2 + $0x58] sm:$0xff] %v1518_v16  ;;  %v1474_v17 = vpop.xlane.xlu1 %1473 }
 0x475   : > { %v2628_v18 = vpop.eup %2627  ;;  %v1490_v7 = vmax.f32 %v1474_v17, 1e-24 }
 0x476   : > { %v1519_v39 = vmul.f32 %v2628_v18, %v3738_v56 }
 0x477   : > { %2633 = vrsqrt.f32 %v1490_v7 }
 0x478   : > { %1535 = vst [vmem:[#allocation2 + $0x60] sm:$0xff] %v1519_v39 }
 0x479   : > { %v2630_v42 = vpop.eup %2629 }
 0x47a   : > { %v1520_v63 = vmul.f32 %v2630_v42, %v3743_v59 }
 0x47c   : > { %1536 = vst [vmem:[#allocation2 + $0x68] sm:$0xff] %v1520_v63 }
 0x47d   : > { %v2632_v49 = vpop.eup %2631 }
 0x47e   : > { %v1521_v25 = vmul.f32 %v2632_v49, %v3748_v13 }
 0x480   : > { %1537 = vst [vmem:[#allocation2 + $0x70] sm:$0xff] %v1521_v25 }
 0x481   : > { %v2634_v62 = vpop.eup %2633 }
 0x482   : > { %v1522_v51 = vmul.f32 %v2634_v62, %v3753_v41 }
 0x484   : > { %1538 = vst [vmem:[#allocation2 + $0x78] sm:$0xff] %v1522_v51 }
 0x485 PF: > { %v1555_v56 = vld [vmem:[%s3334_s21] sm:$0xff]  ;;  %v1556_v14 = vld [vmem:[%s3334_s21 + $0x8] sm:$0xff]  ;;  %v1557_v59 = vld [vmem:[%s3334_s21 + $0x10] sm:$0xff]  ;;  %s3997_s9 = sld [smem:[#allocation21_spill]]  ;;  %s4001_s29 = sld [smem:[#allocation26_spill]] }
 0x486   : > { %v2241_v20 = vpack.c.bf16 %v1556_v14, %v1555_v56  ;;  %v1558_v31 = vld [vmem:[%s3334_s21 + $0x18] sm:$0xff]  ;;  %v1559_v32 = vld [vmem:[%s3334_s21 + $0x20] sm:$0xff]  ;;  %v1560_v34 = vld [vmem:[%s3334_s21 + $0x28] sm:$0xff]  ;;  %s3999_s15 = sld [smem:[#allocation37_spill]]  ;;  %s3822_s26 = scalar_lea.sflag [#allocation5], %s453_s25 }
 0x487   : > { %v2245_v13 = vpack.c.bf16 %v1558_v31, %v1557_v59  ;;  %v2249_v41 = vpack.c.bf16 %v1560_v34, %v1559_v32  ;;  %v1539_v0 = vld [vmem:[#allocation2] sm:$0xff]  ;;  %v1561_v33 = vld [vmem:[%s3334_s21 + $0x30] sm:$0xff]  ;;  %v1562_v4 = vld [vmem:[%s3334_s21 + $0x38] sm:$0xff] }
 0x488   : > { %2242 = vmatprep.subr.bf16.mxu0 %v2241_v20  ;;  %2289 = vmatprep.subr.bf16.mxu1 %v2241_v20  ;;  %v1547_v2 = vld [vmem:[#allocation2 + $0x40] sm:$0xff]  ;;  %v2253_v22 = vpack.c.bf16 %v1562_v4, %v1561_v33  ;;  %v1564_v23 = vld [vmem:[%s3334_s21 + $0x48] sm:$0xff]  ;;  %v1565_v28 = vld [vmem:[%s3334_s21 + $0x50] sm:$0xff] }
 0x489   : > { %2244 = vmatpush3.bf16.msra.mxu0 %v2241_v20  ;;  %2297 = vmatpush3.bf16.msra.mxu1 %v2241_v20  ;;  %v1563_v21 = vld [vmem:[%s3334_s21 + $0x40] sm:$0xff]  ;;  %v1566_v5 = vld [vmem:[%s3334_s21 + $0x58] sm:$0xff]  ;;  %v1568_v3 = vld [vmem:[%s3334_s21 + $0x68] sm:$0xff] }
 0x48a   : > { %2246 = vmatprep.subr.bf16.mxu0 %v2245_v13  ;;  %2290 = vmatprep.subr.bf16.mxu1 %v2245_v13  ;;  %v2257_v30 = vpack.c.bf16 %v1564_v23, %v1563_v21  ;;  %v2261_v36 = vpack.c.bf16 %v1566_v5, %v1565_v28  ;;  %v1567_v37 = vld [vmem:[%s3334_s21 + $0x60] sm:$0xff]  ;;  %v1569_v26 = vld [vmem:[%s3334_s21 + $0x70] sm:$0xff]  ;;  %v1570_v45 = vld [vmem:[%s3334_s21 + $0x78] sm:$0xff]  ;;  %s3995_s21 = sld [smem:[#allocation22_spill]] }
 0x48b   : > { %2089 = vmatprep.mubr.f32.mxu0 %v1539_v0  ;;  %2101 = vmatprep.mubr.f32.mxu1 %v1547_v2  ;;  %v2265_v38 = vpack.c.bf16 %v1568_v3, %v1567_v37  ;;  %v2269_v10 = vpack.c.bf16 %v1570_v45, %v1569_v26  ;;  %v1540_v46 = vld [vmem:[#allocation2 + $0x8] sm:$0xff]  ;;  %v1541_v44 = vld [vmem:[#allocation2 + $0x10] sm:$0xff]  ;;  %v1542_v54 = vld [vmem:[#allocation2 + $0x18] sm:$0xff]  ;;  %p4002_p8 = scmp.ne.s32.totalorder %s4001_s29, 0 }
 0x48c   : > { %v1548_v47 = vld [vmem:[#allocation2 + $0x48] sm:$0xff]  ;;  %v1549_v57 = vld [vmem:[#allocation2 + $0x50] sm:$0xff]  ;;  %v1550_v53 = vld [vmem:[#allocation2 + $0x58] sm:$0xff]  ;;  %s4000_s27 = smov %s3999_s15 }
 0x48d   : > { %2248 = vmatpush3.bf16.msra.mxu0 %v2245_v13  ;;  %2298 = vmatpush3.bf16.msra.mxu1 %v2245_v13  ;;  %v1543_v29 = vld [vmem:[#allocation2 + $0x20] sm:$0xff]  ;;  %v1544_v50 = vld [vmem:[#allocation2 + $0x28] sm:$0xff]  ;;  %v1545_v6 = vld [vmem:[#allocation2 + $0x30] sm:$0xff] }
 0x48e   : > { %2250 = vmatprep.subr.bf16.mxu0 %v2249_v41  ;;  %2291 = vmatprep.subr.bf16.mxu1 %v2249_v41  ;;  %v1551_v19 = vld [vmem:[#allocation2 + $0x60] sm:$0xff]  ;;  %v1552_v52 = vld [vmem:[#allocation2 + $0x68] sm:$0xff]  ;;  %v1553_v24 = vld [vmem:[#allocation2 + $0x70] sm:$0xff] }
 0x48f   : > { %v1546_v55 = vld [vmem:[#allocation2 + $0x38] sm:$0xff]  ;;  %v1936_v61 = vld [vmem:[%s459_s4] ss:$0 sm:$0xff]  ;;  %s1771_s4 = sshll.u32 %s3351_s24, 4  ;;  %s3814_s4 = int_to_ptr.vmem [resolvable:$true] %s1771_s4 }
 0x490   : > { %v1554_v35 = vld [vmem:[#allocation2 + $0x78] sm:$0xff]  ;;  %s1944_s12 = sshll.u32 %s3995_s21, 5  ;;  %s2779_s6 = scalar_lea.vmem %s3814_s4, 2048 }
 0x491   : > { %2252 = vmatpush3.bf16.msra.mxu0 %v2249_v41  ;;  %2299 = vmatpush3.bf16.msra.mxu1 %v2249_v41  ;;  %s1768_s28 = sadd.s32 %s3997_s9, %s1944_s12  ;;  %p2780_p0 = scmp.ne.s32.totalorder %s3814_s4, %s2779_s6 }
 0x492   : > { %2254 = vmatprep.subr.bf16.mxu0 %v2253_v22  ;;  %2292 = vmatprep.subr.bf16.mxu1 %v2253_v22  ;;  %s1940_s10 = sshll.u32 %s1768_s28, 7  ;;  %s2949_s21 = smov [#allocation12]  }
 0x493   : > { %s3812_s13 = scalar_lea.hbm %s3999_s15, %s1940_s10  ;;  %p2781_p7 = pnand %p2780_p0, %p4002_p8 }
 0x494   : > { %s2783_s30 = sshll.u32 %s2949_s21, 4  ;;  %s2784_s30 = int_to_ptr.vmem [resolvable:$false] %s2783_s30 }
 0x495   : > { %2256 = vmatpush3.bf16.msra.mxu0 %v2253_v22  ;;  %2300 = vmatpush3.bf16.msra.mxu1 %v2253_v22  ;;  %p2782_p10 = pneg %p2781_p7  ;;  %s2785_s2 = scalar_lea.vmem %s2784_s30, 4096 }
 0x496   : > { %2258 = vmatprep.subr.bf16.mxu0 %v2257_v30  ;;  %2293 = vmatprep.subr.bf16.mxu1 %v2257_v30  ;;  %p2786_p9 = scmp.lt.s32.totalorder %s3814_s4, %s2784_s30  ;;  %p2787_p1 = scmp.lt.s32.totalorder %s2785_s2, %s2779_s6 }
 0x498   : > { %p2788_p4 = por %p2787_p1, %p2786_p9 }
 0x499   : > { %2260 = vmatpush3.bf16.msra.mxu0 %v2257_v30  ;;  %2301 = vmatpush3.bf16.msra.mxu1 %v2257_v30 }
 0x49a   : > { %2262 = vmatprep.subr.bf16.mxu0 %v2261_v36  ;;  %2294 = vmatprep.subr.bf16.mxu1 %v2261_v36  ;;  %p2789_p3 = pnand %p2788_p4, %p2782_p10 }
 0x49d   : > { %2264 = vmatpush3.bf16.msra.mxu0 %v2261_v36  ;;  %2302 = vmatpush3.bf16.msra.mxu1 %v2261_v36 }
 0x49e   : > { %2266 = vmatprep.subr.bf16.mxu0 %v2265_v38  ;;  %2295 = vmatprep.subr.bf16.mxu1 %v2265_v38 }
 0x4a1   : > { %2268 = vmatpush3.bf16.msra.mxu0 %v2265_v38  ;;  %2303 = vmatpush3.bf16.msra.mxu1 %v2265_v38 }
 0x4a2   : > { %2270 = vmatprep.subr.bf16.mxu0 %v2269_v10  ;;  %2296 = vmatprep.subr.bf16.mxu1 %v2269_v10 }
 0x4a5   : > { %2272 = vmatpush3.bf16.msra.mxu0 %v2269_v10  ;;  %2304 = vmatpush3.bf16.msra.mxu1 %v2269_v10 }
 0x4a8   : > { %2090 = vmatmul.mubr.f32.vlgmr.msra.gmra.mrb[0].mxu0 %v1540_v46  ;;  %2102 = vmatmul.mubr.f32.vlgmr.msra.gmra.mrb[0].mxu1 %v1548_v47 }
 0x4a9   : > { %2092 = vmatprep.mubr.f32.mxu0 %v1541_v44  ;;  %2104 = vmatprep.mubr.f32.mxu1 %v1549_v57 }
 0x4ac   : > { %2093 = vmatmul.mubr.f32.gmra.mrb[2].mxu0 %v1542_v54  ;;  %2105 = vmatmul.mubr.f32.gmra.mrb[2].mxu1 %v1550_v53 }
 0x4ad   : > { %2095 = vmatprep.mubr.f32.mxu0 %v1543_v29  ;;  %2107 = vmatprep.mubr.f32.mxu1 %v1551_v19 }
 0x4b0   : > { %2096 = vmatmul.mubr.f32.gmra.mrb[4].mxu0 %v1544_v50  ;;  %2108 = vmatmul.mubr.f32.gmra.mrb[4].mxu1 %v1552_v52 }
 0x4b1   : > { %2098 = vmatprep.mubr.f32.mxu0 %v1545_v6  ;;  %2110 = vmatprep.mubr.f32.mxu1 %v1553_v24 }
 0x4b4   : > { %2099 = vmatmul.mubr.f32.gmra.mrb[6].mxu0 %v1546_v55  ;;  %2111 = vmatmul.mubr.f32.gmra.mrb[6].mxu1 %v1554_v35 }
 0x57b   : > { %v2091_v27 = vpop.f32.mrb[0].mxu0  ;;  %v2103_v43 = vpop.f32.mrb[0].mxu1 }
 0x57c   : > { %v1724_v8 = vmul.f32 %v2091_v27, %v1936_v61  ;;  %v1732_v60 = vmul.f32 %v2103_v43, %v1936_v61  ;;  %v1637_v1 = vpop.f32.mrb[1].mxu0  ;;  %v1677_v9 = vpop.f32.mrb[1].mxu1 }
 0x57d   : > { %v1723_v11 = vmul.f32 %v1936_v61, %v1637_v1  ;;  %v1731_v40 = vmul.f32 %v1936_v61, %v1677_v9 }
 0x57e   : > { %1740 = vst [vmem:[%s3351_s24 + $0x8] sm:$0xff] %v1724_v8  ;;  %1748 = vst [vmem:[%s3351_s24 + $0x48] sm:$0xff] %v1732_v60 }
 0x57f   : > { %1739 = vst [vmem:[%s3351_s24] sm:$0xff] %v1723_v11  ;;  %1747 = vst [vmem:[%s3351_s24 + $0x40] sm:$0xff] %v1731_v40  ;;  %v2094_v48 = vpop.f32.mrb[2].mxu0  ;;  %v2106_v12 = vpop.f32.mrb[2].mxu1 }
 0x580   : > { %v1726_v58 = vmul.f32 %v2094_v48, %v1936_v61  ;;  %v1734_v15 = vmul.f32 %v2106_v12, %v1936_v61  ;;  %v1647_v16 = vpop.f32.mrb[3].mxu0  ;;  %v1687_v17 = vpop.f32.mrb[3].mxu1 }
 0x581   : > { %v1725_v18 = vmul.f32 %v1936_v61, %v1647_v16  ;;  %v1733_v7 = vmul.f32 %v1936_v61, %v1687_v17 }
 0x582   : > { %1742 = vst [vmem:[%s3351_s24 + $0x18] sm:$0xff] %v1726_v58  ;;  %1750 = vst [vmem:[%s3351_s24 + $0x58] sm:$0xff] %v1734_v15 }
 0x583   : > { %1741 = vst [vmem:[%s3351_s24 + $0x10] sm:$0xff] %v1725_v18  ;;  %1749 = vst [vmem:[%s3351_s24 + $0x50] sm:$0xff] %v1733_v7  ;;  %v2097_v39 = vpop.f32.mrb[4].mxu0  ;;  %v2109_v42 = vpop.f32.mrb[4].mxu1 }
 0x584   : > { %v1728_v63 = vmul.f32 %v2097_v39, %v1936_v61  ;;  %v1736_v49 = vmul.f32 %v2109_v42, %v1936_v61  ;;  %v1657_v25 = vpop.f32.mrb[5].mxu0  ;;  %v1697_v62 = vpop.f32.mrb[5].mxu1 }
 0x585   : > { %v1727_v51 = vmul.f32 %v1936_v61, %v1657_v25  ;;  %v1735_v56 = vmul.f32 %v1936_v61, %v1697_v62 }
 0x586   : > { %1744 = vst [vmem:[%s3351_s24 + $0x28] sm:$0xff] %v1728_v63  ;;  %1752 = vst [vmem:[%s3351_s24 + $0x68] sm:$0xff] %v1736_v49 }
 0x587   : > { %1743 = vst [vmem:[%s3351_s24 + $0x20] sm:$0xff] %v1727_v51  ;;  %1751 = vst [vmem:[%s3351_s24 + $0x60] sm:$0xff] %v1735_v56  ;;  %v2100_v14 = vpop.f32.mrb[6].mxu0  ;;  %v2112_v59 = vpop.f32.mrb[6].mxu1 }
 0x588   : > { %v1730_v20 = vmul.f32 %v2100_v14, %v1936_v61  ;;  %v1738_v31 = vmul.f32 %v2112_v59, %v1936_v61  ;;  %v1667_v13 = vpop.f32.mrb[7].mxu0  ;;  %v1707_v32 = vpop.f32.mrb[7].mxu1 }
 0x589   : > { %v1729_v34 = vmul.f32 %v1936_v61, %v1667_v13  ;;  %v1737_v41 = vmul.f32 %v1936_v61, %v1707_v32 }
 0x58a   : > { %1746 = vst [vmem:[%s3351_s24 + $0x38] sm:$0xff] %v1730_v20  ;;  %1754 = vst [vmem:[%s3351_s24 + $0x78] sm:$0xff] %v1738_v31 }
 0x58b   : > { %1745 = vst [vmem:[%s3351_s24 + $0x30] sm:$0xff] %v1729_v34  ;;  %1753 = vst [vmem:[%s3351_s24 + $0x70] sm:$0xff] %v1737_v41 }
 0x58c   : > { %2792 = shalt.err (!%p2789_p3)
}
 0x58d   : > { %s2793_s25 = scalar_lea.hbm %s3812_s13, 2048  ;;  %s2797_s9 = scalar_lea.hbm %s4000_s27, 8192 }
 0x58e   : > { %p2794_p5 = scmp.ne.s32.totalorder %s3812_s13, %s2793_s25  ;;  %p2798_p2 = scmp.lt.u32.totalorder %s3812_s13, %s4000_s27 }
 0x58f   : > { %p2799_p6 = scmp.lt.u32.totalorder %s2797_s9, %s2793_s25  ;;  %p2801_p0 = scmp.lt.u32.totalorder %s2793_s25, %s3812_s13 }
 0x590   : > { %p2795_p11 = pnand %p2794_p5, %p4002_p8 }
 0x591   : > { %p2800_p12 = por %p2799_p6, %p2798_p2 }
 0x592   : > { %p2796_p13 = pneg %p2795_p11 }
 0x593   : > { %p2802_p7 = por %p2801_p0, %p2800_p12 }
 0x595   : > { %p2803_p10 = pnand %p2802_p7, %p2796_p13 }
 0x597   : > { %2806 = shalt.err (!%p2803_p10)
}
 0x598   : > { %s2950_s10 = smov 128   ;;  %s2951_s0 = smov 256  }
 0x599   : > { %s2952_s19 = smov 8  }
 0x59a   : > { %2321 = dma.vmem_to_hbm [thread:$0]  (%p4002_p8), %s3814_s4, 2048, %s3812_s13, %s3822_s26, %s2950_s10, %s2951_s0, %s2952_s19  }
 0x59b PF: > { %s4003_s1 = sld [smem:[#allocation18_spill]]  ;;  %s4004_s15 = sld [smem:[#allocation27_spill]] }
 0x59c   : > { %p2351_p9 = scmp.ge.s32.totalorder %s2937_s22, 2 }
 0x5a1   : > { %s1786_s6 = sand.u32 1, %s4003_s1   ;;  %p4005_p1 = scmp.ne.s32.totalorder %s4004_s15, 0 }
 0x5a2   : > { %s1787_s21 = scalar_lea.sflag [#allocation5], %s1786_s6 }
 0x5a3   : > { %p2341_p4 = pnand %p2351_p9, %p4005_p1 }
 0x5a5   : > { %2880 = dma.done.wait (!%p2341_p4), %s1787_s21, 2048  }
 0x5a6   : > { %2882 = vsyncadd (!%p2341_p4), %s1787_s21, 4294965248  ;;  %s27_s22 = sadd.s32 1, %s2937_s22   ;;  %s4007_s2 = sld [smem:[#allocation19_spill]] }
 0x5a7   : > { %p3851_p3 = scmp.ge.s32.totalorder %s27_s22, 6   ;;  %s4008_s12 = sld [smem:[#allocation20_spill]] }
 0x5a8   : > { %s4009_s4 = sld [smem:[#allocation30_spill]]  ;;  %s4010_s19 = sld [smem:[#allocation23_spill]] }
 0x5a9   : > { %s4011_s29 = sld [smem:[#allocation28_spill]]  ;;  %s4012_s21 = sld [smem:[#allocation29_spill]] }
 0x5aa   : > { %s4015_s10 = smov %s2893_s11  ;;  %s4016_s11 = smov %s3179_s18 }
 0x5ab   : > { %s4017_s13 = smov %s2905_s14  ;;  %s4019_s15 = smov %s2913_s16 }
 0x5ac   : > { %s4014_s30 = smov %s4007_s2  ;;  %s4020_s16 = smov %s2917_s17 }
 0x5ad   : > { %s4021_s17 = smov %s3176_s8  ;;  %s4022_s18 = smov %s2929_s20 }
 0x5ae   : > { %s4018_s14 = smov %s4009_s4  ;;  %26 = sbr.rel (!%p3851_p3) target bundleno = 20 (0x14), region = 131 }
 0x5af   : > { %s4023_s20 = smov %s4011_s29 }
 0x5b5   :  { %1792 = vsyncpa [#allocation4], 1 }
 0x5b6   :  { %1794 = vsyncpa [#allocation4 + $0x1], 1 }
 0x5b7   :  { %1795 = vsyncpa [#allocation7], 1 }
 0x5b8   :  { %1796 = vsyncpa [#allocation10], 1 }
 0x5b9   :  { %1797 = vsyncpa [#allocation5], 1 }
 0x5ba   :  { %1799 = vsyncpa [#allocation5 + $0x1], 1 }

</bundles_post_ra>
